<compile_context>
chip_gen: v7x
topology: tpu7x:2x2x1
jax: 0.10.0
libtpu: 0.0.40
codegen_flags: <defaults>
</compile_context>

<pallas_src>
import functools

import jax
import jax.numpy as jnp
from jax import lax
from jax.experimental import pallas as pl
from jax.experimental.pallas import tpu as pltpu

EPS = 1e-6


def _rms_f32(x, w):
    """RMSNorm with f32 statistics: x * rsqrt(mean(x^2, -1) + eps) * w."""
    xf = x.astype(jnp.float32)
    var = jnp.mean(xf * xf, axis=-1, keepdims=True)
    return xf * lax.rsqrt(var + EPS) * w.astype(jnp.float32)


# ---------------------------------------------------------------------------
# Fused GradMakerLayer kernel — one grid point per batch element.
# ---------------------------------------------------------------------------
def _grad_maker_layer_kernel(
    peft_ref,        # [1, p_seq, D]   activation dtype
    model_ref,       # [1, m_seq, D]
    mask_ref,        # [1, 1, p_seq, m_seq]  additive mask (activation dtype)
    cos_ref,         # [m_seq, D] f32  per-head cos table tiled along lanes
    sin_neg_ref,     # [m_seq, D] f32  -sin on first-half-of-head lanes, 0 else
    sin_pos_ref,     # [m_seq, D] f32  +sin on second-half-of-head lanes, 0 else
    peft_ln_ref, model_ln_ref, post_ln_ref,   # [1, D]
    wq_ref,          # [D, D]
    wkv_ref,         # [D, 2D]       (wk | wv fused)
    wo_ref,          # [D, D]
    wgu_ref,         # [D, 2*inter]  (wg | wu fused)
    wd_ref,          # [inter, D]
    o_ref,           # [1, p_seq, D]
    attn_acc_ref,    # VMEM scratch [p_seq, D] f32
    *, n_heads, scale):

    dtype = peft_ref.dtype
    peft = peft_ref[0]                             # [p_seq, D]
    model = model_ref[0]                           # [m_seq, D]
    mask = mask_ref[0, 0].astype(jnp.float32)      # [p_seq, m_seq]

    D = peft.shape[-1]
    hd = D // n_heads
    half = hd // 2
    inter = wd_ref.shape[0]

    # ---- pre-attention RMSNorms (f32 stats) + projections --------------------
    n_peft = _rms_f32(peft, peft_ln_ref[...]).astype(dtype)
    n_model = _rms_f32(model, model_ln_ref[...]).astype(dtype)

    # Softmax scale folded into Q once (instead of scaling each score tile).
    q = (jnp.dot(n_peft, wq_ref[...], preferred_element_type=jnp.float32)
         * scale).astype(dtype)                                     # [p_seq, D]

    # Fused K|V projection: one MXU pass over the model stream.
    kv = jnp.dot(n_model, wkv_ref[...], preferred_element_type=jnp.float32)
    k = kv[:, :D]                                                   # f32 [m_seq, D]
    v = kv[:, D:].astype(dtype)                                     # [m_seq, D]

    # ---- rotary on K (head-count independent) ---------------------------------
    # rotate_half within each hd-block == two static lane rolls of the packed K;
    # the sign and half-of-head selection live in the precomputed sin tables.
    k = (k * cos_ref[...]
         + pltpu.roll(k, D - half, 1) * sin_neg_ref[...]
         + pltpu.roll(k, half, 1) * sin_pos_ref[...]).astype(dtype)

    # ---- SDPA: all heads of this batch, streamed into the VMEM scratch --------
    for h in range(n_heads):                       # static unroll, bounded vregs
        sl = slice(h * hd, (h + 1) * hd)
        qh, kh, vh = q[:, sl], k[:, sl], v[:, sl]
        # NT matmul: contract last dim of both operands (no kh.T on the XLU).
        s = lax.dot_general(qh, kh, (((1,), (1,)), ((), ())),
                            preferred_element_type=jnp.float32) + mask
        m = jnp.max(s, axis=-1, keepdims=True)
        p = jnp.exp(s - m)
        inv = pl.reciprocal(jnp.sum(p, axis=-1, keepdims=True), approx=True)
        attn_w = (p * inv).astype(dtype)
        attn_acc_ref[:, sl] = jnp.dot(attn_w, vh,
                                      preferred_element_type=jnp.float32)

    attn = attn_acc_ref[...].astype(dtype)                          # [p_seq, D]

    # ---- output projection + residual (kept in f32) ---------------------------
    h1 = peft.astype(jnp.float32) + jnp.dot(
        attn, wo_ref[...], preferred_element_type=jnp.float32)

    # ---- post-attention RMSNorm + fused gate/up MLP + residual ----------------
    n_post = _rms_f32(h1, post_ln_ref[...]).astype(dtype)
    gu = jnp.dot(n_post, wgu_ref[...], preferred_element_type=jnp.float32)
    g, u = gu[:, :inter], gu[:, inter:]
    act = (g * jax.nn.sigmoid(g) * u).astype(dtype)
    mlp_out = jnp.dot(act, wd_ref[...], preferred_element_type=jnp.float32)

    o_ref[0] = (h1 + mlp_out).astype(o_ref.dtype)


# ---------------------------------------------------------------------------
# Wrapper
# ---------------------------------------------------------------------------
def grad_maker_layer_forward(params, peft_hidden_states, model_hidden_states,
                             cos, sin, attention_mask, *, n_heads):
    B, p_seq, D = peft_hidden_states.shape
    _, m_seq, _ = model_hidden_states.shape
    hd = D // n_heads
    half = hd // 2
    inter = params["wd"].shape[0]
    scale = 1.0 / (hd ** 0.5)
    act_dtype = peft_hidden_states.dtype

    # Rotary tables, tiled lane-dense to [m_seq, D] once. rotate_half's sign
    # and half-of-head selection are folded into two masked sin tables so the
    # in-kernel rotary is 2 rolls + 3 multiply-adds, independent of n_heads.
    cos_p = jnp.tile(cos.reshape(m_seq, hd), (1, n_heads)).astype(jnp.float32)
    sin_p = jnp.tile(sin.reshape(m_seq, hd), (1, n_heads)).astype(jnp.float32)
    first_half = (jnp.arange(D) % hd) < half
    sin_neg = jnp.where(first_half[None, :], -sin_p, 0.0)
    sin_pos = jnp.where(first_half[None, :], 0.0, sin_p)

    mask = attention_mask.astype(act_dtype)   # DMA the mask in activation dtype

    ln2d = lambda w: w.reshape(1, D)

    def const_spec(shape):
        # Full-extent block with a constant index_map: staged into VMEM once,
        # reused across all grid steps (no re-fetch).
        return pl.BlockSpec(shape, lambda b: (0,) * len(shape))

    kern = functools.partial(_grad_maker_layer_kernel,
                             n_heads=n_heads, scale=scale)

    return pl.pallas_call(
        kern,
        out_shape=jax.ShapeDtypeStruct((B, p_seq, D), act_dtype),
        grid=(B,),
        in_specs=[
            pl.BlockSpec((1, p_seq, D), lambda b: (b, 0, 0)),            # peft
            pl.BlockSpec((1, m_seq, D), lambda b: (b, 0, 0)),            # model
            pl.BlockSpec((1, 1, p_seq, m_seq), lambda b: (b, 0, 0, 0)),  # mask
            const_spec((m_seq, D)),       # cos (packed)
            const_spec((m_seq, D)),       # sin_neg (packed, masked, signed)
            const_spec((m_seq, D)),       # sin_pos (packed, masked)
            const_spec((1, D)),           # peft_ln
            const_spec((1, D)),           # model_ln
            const_spec((1, D)),           # post_ln
            const_spec((D, D)),           # wq
            const_spec((D, 2 * D)),       # wkv
            const_spec((D, D)),           # wo
            const_spec((D, 2 * inter)),   # wgu
            const_spec((inter, D)),       # wd
        ],
        out_specs=pl.BlockSpec((1, p_seq, D), lambda b: (b, 0, 0)),
        scratch_shapes=[pltpu.VMEM((p_seq, D), jnp.float32)],
        compiler_params=pltpu.CompilerParams(
            dimension_semantics=("parallel",),
            vmem_limit_bytes=64 * 1024 * 1024),
    )(peft_hidden_states, model_hidden_states, mask,
      cos_p, sin_neg, sin_pos,
      ln2d(params["peft_ln"]), ln2d(params["model_ln"]), ln2d(params["post_ln"]),
      params["wq"], params["wkv"], params["wo"], params["wgu"], params["wd"])


# ---------------------------------------------------------------------------
# Deterministic setup, pure-JAX reference, and run
# ---------------------------------------------------------------------------
def make_params(key, dim, inter, dtype=jnp.bfloat16):
    ks = jax.random.split(key, 7)
    init = lambda k, shape: (0.02 * jax.random.normal(k, shape)).astype(dtype)
    wk, wv = init(ks[1], (dim, dim)), init(ks[2], (dim, dim))
    wg, wu = init(ks[4], (dim, inter)), init(ks[5], (dim, inter))
    return {
        "peft_ln": jnp.ones((dim,), dtype),
        "model_ln": jnp.ones((dim,), dtype),
        "post_ln": jnp.ones((dim,), dtype),
        "wq": init(ks[0], (dim, dim)),
        # K|V and gate|up fused OFFLINE (free): halves MXU launches on those
        # paths and the number of weight DMA specs.
        "wkv": jnp.concatenate([wk, wv], axis=1),
        "wo": init(ks[3], (dim, dim)),
        "wgu": jnp.concatenate([wg, wu], axis=1),
        "wd": init(ks[6], (inter, dim)),
    }


def make_rotary(m_seq, head_dim):
    inv_freq = 1.0 / (10000.0 ** (jnp.arange(0, head_dim, 2, dtype=jnp.float32)
                                  / head_dim))
    pos = jnp.arange(m_seq, dtype=jnp.float32)
    freqs = pos[:, None] * inv_freq[None, :]                 # [m_seq, hd/2]
    emb = jnp.concatenate([freqs, freqs], axis=-1)           # [m_seq, hd]
    cos = jnp.cos(emb).reshape(1, 1, m_seq, head_dim)
    sin = jnp.sin(emb).reshape(1, 1, m_seq, head_dim)
    return cos, sin


def reference_forward(params, peft, model, cos, sin, mask, *, n_heads):
    """Pure-JAX (f32) reference matching the PyTorch GradMakerLayer forward."""
    f32 = jnp.float32
    B, p_seq, D = peft.shape
    m_seq = model.shape[1]
    hd = D // n_heads
    inter = params["wd"].shape[0]

    def rms(x, w):
        xf = x.astype(f32)
        var = jnp.mean(xf * xf, axis=-1, keepdims=True)
        return xf * lax.rsqrt(var + EPS) * w.astype(f32)

    wq = params["wq"].astype(f32)
    wk, wv = params["wkv"][:, :D].astype(f32), params["wkv"][:, D:].astype(f32)
    wo = params["wo"].astype(f32)
    wg, wu = params["wgu"][:, :inter].astype(f32), params["wgu"][:, inter:].astype(f32)
    wd = params["wd"].astype(f32)

    n_peft = rms(peft, params["peft_ln"])
    n_model = rms(model, params["model_ln"])

    def split_heads(x, seq):
        return x.reshape(B, seq, n_heads, hd).transpose(0, 2, 1, 3)

    q = split_heads(n_peft @ wq, p_seq)
    k = split_heads(n_model @ wk, m_seq)
    v = split_heads(n_model @ wv, m_seq)

    def rotate_half(x):
        x1, x2 = x[..., :hd // 2], x[..., hd // 2:]
        return jnp.concatenate([-x2, x1], axis=-1)

    k = k * cos.astype(f32) + rotate_half(k) * sin.astype(f32)

    s = jnp.einsum("bhqd,bhkd->bhqk", q, k) / (hd ** 0.5) + mask.astype(f32)
    p = jax.nn.softmax(s, axis=-1)
    attn = jnp.einsum("bhqk,bhkd->bhqd", p, v)
    attn = attn.transpose(0, 2, 1, 3).reshape(B, p_seq, D)

    h1 = peft.astype(f32) + attn @ wo
    n_post = rms(h1, params["post_ln"])
    g, u = n_post @ wg, n_post @ wu
    mlp = (g * jax.nn.sigmoid(g) * u) @ wd
    return h1 + mlp


if __name__ == "__main__":
    B, p_seq, m_seq = 2, 8, 8
    dim, n_heads = 32, 4
    inter = 64
    head_dim = dim // n_heads
    dtype = jnp.bfloat16          # MXU-native operand dtype (per perf review)

    key = jax.random.PRNGKey(0)
    kp, km, kw = jax.random.split(key, 3)

    peft_hidden_states = jax.random.normal(kp, (B, p_seq, dim)).astype(dtype)
    model_hidden_states = jax.random.normal(km, (B, m_seq, dim)).astype(dtype)
    cos, sin = make_rotary(m_seq, head_dim)
    # additive attention mask (all-visible); broadcastable to [B, H, p_seq, m_seq]
    attention_mask = jnp.zeros((B, 1, p_seq, m_seq), jnp.float32)

    params = make_params(kw, dim, inter, dtype)

    fwd = jax.jit(functools.partial(grad_maker_layer_forward, n_heads=n_heads))
    out = fwd(params, peft_hidden_states, model_hidden_states, cos, sin,
              attention_mask)
    jax.block_until_ready(out)
    assert out.shape == (B, p_seq, dim)

    ref = reference_forward(params, peft_hidden_states, model_hidden_states,
                            cos, sin, attention_mask, n_heads=n_heads)
    max_err = jnp.max(jnp.abs(out.astype(jnp.float32) - ref))
    assert bool(max_err < 7.5e-2), f"max abs error too large: {max_err}"
    print("KERNEL_OK")
</pallas_src>

<mosaic_0001>
module attributes {stable_mosaic.version = 11 : i64} {
  func.func @_grad_maker_layer_kernel(%arg0: i32, %arg1: memref<1x8x32xbf16, #tpu.memory_space<vmem>>, %arg2: memref<1x8x32xbf16, #tpu.memory_space<vmem>>, %arg3: memref<1x1x8x8xbf16, #tpu.memory_space<vmem>>, %arg4: memref<8x32xf32, #tpu.memory_space<vmem>>, %arg5: memref<8x32xf32, #tpu.memory_space<vmem>>, %arg6: memref<8x32xf32, #tpu.memory_space<vmem>>, %arg7: memref<1x32xbf16, #tpu.memory_space<vmem>>, %arg8: memref<1x32xbf16, #tpu.memory_space<vmem>>, %arg9: memref<1x32xbf16, #tpu.memory_space<vmem>>, %arg10: memref<32x32xbf16, #tpu.memory_space<vmem>>, %arg11: memref<32x64xbf16, #tpu.memory_space<vmem>>, %arg12: memref<32x32xbf16, #tpu.memory_space<vmem>>, %arg13: memref<32x128xbf16, #tpu.memory_space<vmem>>, %arg14: memref<64x32xbf16, #tpu.memory_space<vmem>>, %arg15: memref<1x8x32xbf16, #tpu.memory_space<vmem>>, %arg16: memref<8x32xf32, #tpu.memory_space<vmem>>) attributes {dimension_semantics = [#tpu.dimension_semantics<parallel>], iteration_bounds = array<i64: 2>, scalar_prefetch = 0 : i64, scratch_operands = 1 : i64, tpu.core_type = #tpu.core_type<tc>, window_params = [{transform_indices = @transform_0, window_bounds = array<i64: 1, 8, 32>}, {transform_indices = @transform_1, window_bounds = array<i64: 1, 8, 32>}, {transform_indices = @transform_2, window_bounds = array<i64: 1, 1, 8, 8>}, {pipeline_mode = #tpu.pipeline_mode<synchronous>, transform_indices = @transform_3, window_bounds = array<i64: 8, 32>}, {pipeline_mode = #tpu.pipeline_mode<synchronous>, transform_indices = @transform_4, window_bounds = array<i64: 8, 32>}, {pipeline_mode = #tpu.pipeline_mode<synchronous>, transform_indices = @transform_5, window_bounds = array<i64: 8, 32>}, {pipeline_mode = #tpu.pipeline_mode<synchronous>, transform_indices = @transform_6, window_bounds = array<i64: 1, 32>}, {pipeline_mode = #tpu.pipeline_mode<synchronous>, transform_indices = @transform_7, window_bounds = array<i64: 1, 32>}, {pipeline_mode = #tpu.pipeline_mode<synchronous>, transform_indices = @transform_8, window_bounds = array<i64: 1, 32>}, {pipeline_mode = #tpu.pipeline_mode<synchronous>, transform_indices = @transform_9, window_bounds = array<i64: 32, 32>}, {pipeline_mode = #tpu.pipeline_mode<synchronous>, transform_indices = @transform_10, window_bounds = array<i64: 32, 64>}, {pipeline_mode = #tpu.pipeline_mode<synchronous>, transform_indices = @transform_11, window_bounds = array<i64: 32, 32>}, {pipeline_mode = #tpu.pipeline_mode<synchronous>, transform_indices = @transform_12, window_bounds = array<i64: 32, 128>}, {pipeline_mode = #tpu.pipeline_mode<synchronous>, transform_indices = @transform_13, window_bounds = array<i64: 64, 32>}, {transform_indices = @transform_14, window_bounds = array<i64: 1, 8, 32>}]} {
    %c0 = arith.constant 0 : index
    %c0_0 = arith.constant 0 : index
    %c0_1 = arith.constant 0 : index
    %0 = vector.load %arg1[%c0, %c0_0, %c0_1] : memref<1x8x32xbf16, #tpu.memory_space<vmem>>, vector<1x8x32xbf16>
    %1 = vector.shape_cast %0 : vector<1x8x32xbf16> to vector<8x32xbf16>
    %c0_2 = arith.constant 0 : index
    %c0_3 = arith.constant 0 : index
    %c0_4 = arith.constant 0 : index
    %2 = vector.load %arg2[%c0_2, %c0_3, %c0_4] : memref<1x8x32xbf16, #tpu.memory_space<vmem>>, vector<1x8x32xbf16>
    %3 = vector.shape_cast %2 : vector<1x8x32xbf16> to vector<8x32xbf16>
    %c0_5 = arith.constant 0 : index
    %c0_6 = arith.constant 0 : index
    %c0_7 = arith.constant 0 : index
    %c0_8 = arith.constant 0 : index
    %4 = vector.load %arg3[%c0_5, %c0_6, %c0_7, %c0_8] : memref<1x1x8x8xbf16, #tpu.memory_space<vmem>>, vector<1x1x8x8xbf16>
    %5 = vector.shape_cast %4 : vector<1x1x8x8xbf16> to vector<8x8xbf16>
    %6 = arith.extf %5 : vector<8x8xbf16> to vector<8x8xf32>
    %c0_9 = arith.constant 0 : index
    %c0_10 = arith.constant 0 : index
    %7 = vector.load %arg7[%c0_9, %c0_10] : memref<1x32xbf16, #tpu.memory_space<vmem>>, vector<1x32xbf16>
    %8 = arith.extf %1 : vector<8x32xbf16> to vector<8x32xf32>
    %9 = arith.mulf %8, %8 : vector<8x32xf32>
    %cst = arith.constant dense<0.000000e+00> : vector<8xf32>
    %10 = vector.multi_reduction <add>, %9, %cst [1] : vector<8x32xf32> to vector<8xf32>
    %11 = vector.shape_cast %10 : vector<8xf32> to vector<8x1xf32>
    %cst_11 = arith.constant 3.200000e+01 : f32
    %12 = vector.broadcast %cst_11 : f32 to vector<8x1xf32>
    %13 = arith.divf %11, %12 : vector<8x1xf32>
    %cst_12 = arith.constant 9.99999997E-7 : f32
    %14 = vector.broadcast %cst_12 : f32 to vector<8x1xf32>
    %15 = arith.addf %13, %14 : vector<8x1xf32>
    %16 = math.rsqrt %15 : vector<8x1xf32>
    %17 = vector.broadcast %16 : vector<8x1xf32> to vector<8x32xf32>
    %18 = arith.mulf %8, %17 : vector<8x32xf32>
    %19 = arith.extf %7 : vector<1x32xbf16> to vector<1x32xf32>
    %20 = vector.broadcast %19 : vector<1x32xf32> to vector<8x32xf32>
    %21 = arith.mulf %18, %20 : vector<8x32xf32>
    %22 = arith.truncf %21 : vector<8x32xf32> to vector<8x32xbf16>
    %c0_13 = arith.constant 0 : index
    %c0_14 = arith.constant 0 : index
    %23 = vector.load %arg8[%c0_13, %c0_14] : memref<1x32xbf16, #tpu.memory_space<vmem>>, vector<1x32xbf16>
    %24 = arith.extf %3 : vector<8x32xbf16> to vector<8x32xf32>
    %25 = arith.mulf %24, %24 : vector<8x32xf32>
    %cst_15 = arith.constant dense<0.000000e+00> : vector<8xf32>
    %26 = vector.multi_reduction <add>, %25, %cst_15 [1] : vector<8x32xf32> to vector<8xf32>
    %27 = vector.shape_cast %26 : vector<8xf32> to vector<8x1xf32>
    %cst_16 = arith.constant 3.200000e+01 : f32
    %28 = vector.broadcast %cst_16 : f32 to vector<8x1xf32>
    %29 = arith.divf %27, %28 : vector<8x1xf32>
    %cst_17 = arith.constant 9.99999997E-7 : f32
    %30 = vector.broadcast %cst_17 : f32 to vector<8x1xf32>
    %31 = arith.addf %29, %30 : vector<8x1xf32>
    %32 = math.rsqrt %31 : vector<8x1xf32>
    %33 = vector.broadcast %32 : vector<8x1xf32> to vector<8x32xf32>
    %34 = arith.mulf %24, %33 : vector<8x32xf32>
    %35 = arith.extf %23 : vector<1x32xbf16> to vector<1x32xf32>
    %36 = vector.broadcast %35 : vector<1x32xf32> to vector<8x32xf32>
    %37 = arith.mulf %34, %36 : vector<8x32xf32>
    %38 = arith.truncf %37 : vector<8x32xf32> to vector<8x32xbf16>
    %c0_18 = arith.constant 0 : index
    %c0_19 = arith.constant 0 : index
    %39 = vector.load %arg10[%c0_18, %c0_19] : memref<32x32xbf16, #tpu.memory_space<vmem>>, vector<32x32xbf16>
    %cst_20 = arith.constant dense<0.000000e+00> : vector<8x32xf32>
    %40 = tpu.matmul %22, %39, %cst_20 {dimension_numbers = #tpu.dot_dimension_numbers<[1], [0], [0], [1], [0, 0, 1, 1], [], []>} : vector<8x32xbf16>, vector<32x32xbf16>, vector<8x32xf32> -> vector<8x32xf32>
    %cst_21 = arith.constant 0.353553385 : f32
    %41 = vector.broadcast %cst_21 : f32 to vector<8x32xf32>
    %42 = arith.mulf %40, %41 : vector<8x32xf32>
    %43 = arith.truncf %42 : vector<8x32xf32> to vector<8x32xbf16>
    %c0_22 = arith.constant 0 : index
    %c0_23 = arith.constant 0 : index
    %44 = vector.load %arg11[%c0_22, %c0_23] : memref<32x64xbf16, #tpu.memory_space<vmem>>, vector<32x64xbf16>
    %cst_24 = arith.constant dense<0.000000e+00> : vector<8x64xf32>
    %45 = tpu.matmul %38, %44, %cst_24 {dimension_numbers = #tpu.dot_dimension_numbers<[1], [0], [0], [1], [0, 0, 1, 1], [], []>} : vector<8x32xbf16>, vector<32x64xbf16>, vector<8x64xf32> -> vector<8x64xf32>
    %46 = vector.extract_strided_slice %45 {offsets = [0, 0], sizes = [8, 32], strides = [1, 1]} : vector<8x64xf32> to vector<8x32xf32>
    %47 = vector.extract_strided_slice %45 {offsets = [0, 32], sizes = [8, 32], strides = [1, 1]} : vector<8x64xf32> to vector<8x32xf32>
    %48 = arith.truncf %47 : vector<8x32xf32> to vector<8x32xbf16>
    %c0_25 = arith.constant 0 : index
    %c0_26 = arith.constant 0 : index
    %49 = vector.load %arg4[%c0_25, %c0_26] : memref<8x32xf32, #tpu.memory_space<vmem>>, vector<8x32xf32>
    %50 = arith.mulf %46, %49 : vector<8x32xf32>
    %c28_i32 = arith.constant 28 : i32
    %51 = tpu.dynamic_rotate %46 by %c28_i32 dim 1 : vector<8x32xf32>, i32 -> vector<8x32xf32>
    %c0_27 = arith.constant 0 : index
    %c0_28 = arith.constant 0 : index
    %52 = vector.load %arg5[%c0_27, %c0_28] : memref<8x32xf32, #tpu.memory_space<vmem>>, vector<8x32xf32>
    %53 = arith.mulf %51, %52 : vector<8x32xf32>
    %54 = arith.addf %50, %53 : vector<8x32xf32>
    %c4_i32 = arith.constant 4 : i32
    %55 = tpu.dynamic_rotate %46 by %c4_i32 dim 1 : vector<8x32xf32>, i32 -> vector<8x32xf32>
    %c0_29 = arith.constant 0 : index
    %c0_30 = arith.constant 0 : index
    %56 = vector.load %arg6[%c0_29, %c0_30] : memref<8x32xf32, #tpu.memory_space<vmem>>, vector<8x32xf32>
    %57 = arith.mulf %55, %56 : vector<8x32xf32>
    %58 = arith.addf %54, %57 : vector<8x32xf32>
    %59 = arith.truncf %58 : vector<8x32xf32> to vector<8x32xbf16>
    %60 = vector.extract_strided_slice %43 {offsets = [0, 0], sizes = [8, 8], strides = [1, 1]} : vector<8x32xbf16> to vector<8x8xbf16>
    %61 = vector.extract_strided_slice %59 {offsets = [0, 0], sizes = [8, 8], strides = [1, 1]} : vector<8x32xbf16> to vector<8x8xbf16>
    %62 = vector.extract_strided_slice %48 {offsets = [0, 0], sizes = [8, 8], strides = [1, 1]} : vector<8x32xbf16> to vector<8x8xbf16>
    %cst_31 = arith.constant dense<0.000000e+00> : vector<8x8xf32>
    %63 = tpu.matmul %60, %61, %cst_31 {dimension_numbers = #tpu.dot_dimension_numbers<[1], [1], [0], [0], [0, 0, 1, 0], [], []>} : vector<8x8xbf16>, vector<8x8xbf16>, vector<8x8xf32> -> vector<8x8xf32>
    %64 = arith.addf %63, %6 : vector<8x8xf32>
    %cst_32 = arith.constant dense<0xFF800000> : vector<8xf32>
    %65 = vector.multi_reduction <maximumf>, %64, %cst_32 [1] : vector<8x8xf32> to vector<8xf32>
    %66 = vector.shape_cast %65 : vector<8xf32> to vector<8x1xf32>
    %67 = vector.broadcast %66 : vector<8x1xf32> to vector<8x8xf32>
    %68 = arith.subf %64, %67 : vector<8x8xf32>
    %69 = math.exp %68 : vector<8x8xf32>
    %cst_33 = arith.constant dense<0.000000e+00> : vector<8xf32>
    %70 = vector.multi_reduction <add>, %69, %cst_33 [1] : vector<8x8xf32> to vector<8xf32>
    %71 = vector.shape_cast %70 : vector<8xf32> to vector<8x1xf32>
    %72 = tpu.reciprocal %71 {approx = true} : vector<8x1xf32> -> vector<8x1xf32>
    %73 = vector.broadcast %72 : vector<8x1xf32> to vector<8x8xf32>
    %74 = arith.mulf %69, %73 : vector<8x8xf32>
    %75 = arith.truncf %74 : vector<8x8xf32> to vector<8x8xbf16>
    %cst_34 = arith.constant dense<0.000000e+00> : vector<8x8xf32>
    %76 = tpu.matmul %75, %62, %cst_34 {dimension_numbers = #tpu.dot_dimension_numbers<[1], [0], [0], [1], [0, 0, 1, 1], [], []>} : vector<8x8xbf16>, vector<8x8xbf16>, vector<8x8xf32> -> vector<8x8xf32>
    %c0_35 = arith.constant 0 : index
    %c0_36 = arith.constant 0 : index
    %77 = vector.load %arg16[%c0_35, %c0_36] : memref<8x32xf32, #tpu.memory_space<vmem>>, vector<8x8xf32>
    tpu.vector_store %arg16[%c0_35, %c0_36], %76 {strides = array<i32>} : memref<8x32xf32, #tpu.memory_space<vmem>>, vector<8x8xf32>,
    %78 = vector.extract_strided_slice %43 {offsets = [0, 8], sizes = [8, 8], strides = [1, 1]} : vector<8x32xbf16> to vector<8x8xbf16>
    %79 = vector.extract_strided_slice %59 {offsets = [0, 8], sizes = [8, 8], strides = [1, 1]} : vector<8x32xbf16> to vector<8x8xbf16>
    %80 = vector.extract_strided_slice %48 {offsets = [0, 8], sizes = [8, 8], strides = [1, 1]} : vector<8x32xbf16> to vector<8x8xbf16>
    %cst_37 = arith.constant dense<0.000000e+00> : vector<8x8xf32>
    %81 = tpu.matmul %78, %79, %cst_37 {dimension_numbers = #tpu.dot_dimension_numbers<[1], [1], [0], [0], [0, 0, 1, 0], [], []>} : vector<8x8xbf16>, vector<8x8xbf16>, vector<8x8xf32> -> vector<8x8xf32>
    %82 = arith.addf %81, %6 : vector<8x8xf32>
    %cst_38 = arith.constant dense<0xFF800000> : vector<8xf32>
    %83 = vector.multi_reduction <maximumf>, %82, %cst_38 [1] : vector<8x8xf32> to vector<8xf32>
    %84 = vector.shape_cast %83 : vector<8xf32> to vector<8x1xf32>
    %85 = vector.broadcast %84 : vector<8x1xf32> to vector<8x8xf32>
    %86 = arith.subf %82, %85 : vector<8x8xf32>
    %87 = math.exp %86 : vector<8x8xf32>
    %cst_39 = arith.constant dense<0.000000e+00> : vector<8xf32>
    %88 = vector.multi_reduction <add>, %87, %cst_39 [1] : vector<8x8xf32> to vector<8xf32>
    %89 = vector.shape_cast %88 : vector<8xf32> to vector<8x1xf32>
    %90 = tpu.reciprocal %89 {approx = true} : vector<8x1xf32> -> vector<8x1xf32>
    %91 = vector.broadcast %90 : vector<8x1xf32> to vector<8x8xf32>
    %92 = arith.mulf %87, %91 : vector<8x8xf32>
    %93 = arith.truncf %92 : vector<8x8xf32> to vector<8x8xbf16>
    %cst_40 = arith.constant dense<0.000000e+00> : vector<8x8xf32>
    %94 = tpu.matmul %93, %80, %cst_40 {dimension_numbers = #tpu.dot_dimension_numbers<[1], [0], [0], [1], [0, 0, 1, 1], [], []>} : vector<8x8xbf16>, vector<8x8xbf16>, vector<8x8xf32> -> vector<8x8xf32>
    %c0_41 = arith.constant 0 : index
    %c8 = arith.constant 8 : index
    %95 = vector.load %arg16[%c0_41, %c8] : memref<8x32xf32, #tpu.memory_space<vmem>>, vector<8x8xf32>
    tpu.vector_store %arg16[%c0_41, %c8], %94 {strides = array<i32>} : memref<8x32xf32, #tpu.memory_space<vmem>>, vector<8x8xf32>,
    %96 = vector.extract_strided_slice %43 {offsets = [0, 16], sizes = [8, 8], strides = [1, 1]} : vector<8x32xbf16> to vector<8x8xbf16>
    %97 = vector.extract_strided_slice %59 {offsets = [0, 16], sizes = [8, 8], strides = [1, 1]} : vector<8x32xbf16> to vector<8x8xbf16>
    %98 = vector.extract_strided_slice %48 {offsets = [0, 16], sizes = [8, 8], strides = [1, 1]} : vector<8x32xbf16> to vector<8x8xbf16>
    %cst_42 = arith.constant dense<0.000000e+00> : vector<8x8xf32>
    %99 = tpu.matmul %96, %97, %cst_42 {dimension_numbers = #tpu.dot_dimension_numbers<[1], [1], [0], [0], [0, 0, 1, 0], [], []>} : vector<8x8xbf16>, vector<8x8xbf16>, vector<8x8xf32> -> vector<8x8xf32>
    %100 = arith.addf %99, %6 : vector<8x8xf32>
    %cst_43 = arith.constant dense<0xFF800000> : vector<8xf32>
    %101 = vector.multi_reduction <maximumf>, %100, %cst_43 [1] : vector<8x8xf32> to vector<8xf32>
    %102 = vector.shape_cast %101 : vector<8xf32> to vector<8x1xf32>
    %103 = vector.broadcast %102 : vector<8x1xf32> to vector<8x8xf32>
    %104 = arith.subf %100, %103 : vector<8x8xf32>
    %105 = math.exp %104 : vector<8x8xf32>
    %cst_44 = arith.constant dense<0.000000e+00> : vector<8xf32>
    %106 = vector.multi_reduction <add>, %105, %cst_44 [1] : vector<8x8xf32> to vector<8xf32>
    %107 = vector.shape_cast %106 : vector<8xf32> to vector<8x1xf32>
    %108 = tpu.reciprocal %107 {approx = true} : vector<8x1xf32> -> vector<8x1xf32>
    %109 = vector.broadcast %108 : vector<8x1xf32> to vector<8x8xf32>
    %110 = arith.mulf %105, %109 : vector<8x8xf32>
    %111 = arith.truncf %110 : vector<8x8xf32> to vector<8x8xbf16>
    %cst_45 = arith.constant dense<0.000000e+00> : vector<8x8xf32>
    %112 = tpu.matmul %111, %98, %cst_45 {dimension_numbers = #tpu.dot_dimension_numbers<[1], [0], [0], [1], [0, 0, 1, 1], [], []>} : vector<8x8xbf16>, vector<8x8xbf16>, vector<8x8xf32> -> vector<8x8xf32>
    %c0_46 = arith.constant 0 : index
    %c16 = arith.constant 16 : index
    %113 = vector.load %arg16[%c0_46, %c16] : memref<8x32xf32, #tpu.memory_space<vmem>>, vector<8x8xf32>
    tpu.vector_store %arg16[%c0_46, %c16], %112 {strides = array<i32>} : memref<8x32xf32, #tpu.memory_space<vmem>>, vector<8x8xf32>,
    %114 = vector.extract_strided_slice %43 {offsets = [0, 24], sizes = [8, 8], strides = [1, 1]} : vector<8x32xbf16> to vector<8x8xbf16>
    %115 = vector.extract_strided_slice %59 {offsets = [0, 24], sizes = [8, 8], strides = [1, 1]} : vector<8x32xbf16> to vector<8x8xbf16>
    %116 = vector.extract_strided_slice %48 {offsets = [0, 24], sizes = [8, 8], strides = [1, 1]} : vector<8x32xbf16> to vector<8x8xbf16>
    %cst_47 = arith.constant dense<0.000000e+00> : vector<8x8xf32>
    %117 = tpu.matmul %114, %115, %cst_47 {dimension_numbers = #tpu.dot_dimension_numbers<[1], [1], [0], [0], [0, 0, 1, 0], [], []>} : vector<8x8xbf16>, vector<8x8xbf16>, vector<8x8xf32> -> vector<8x8xf32>
    %118 = arith.addf %117, %6 : vector<8x8xf32>
    %cst_48 = arith.constant dense<0xFF800000> : vector<8xf32>
    %119 = vector.multi_reduction <maximumf>, %118, %cst_48 [1] : vector<8x8xf32> to vector<8xf32>
    %120 = vector.shape_cast %119 : vector<8xf32> to vector<8x1xf32>
    %121 = vector.broadcast %120 : vector<8x1xf32> to vector<8x8xf32>
    %122 = arith.subf %118, %121 : vector<8x8xf32>
    %123 = math.exp %122 : vector<8x8xf32>
    %cst_49 = arith.constant dense<0.000000e+00> : vector<8xf32>
    %124 = vector.multi_reduction <add>, %123, %cst_49 [1] : vector<8x8xf32> to vector<8xf32>
    %125 = vector.shape_cast %124 : vector<8xf32> to vector<8x1xf32>
    %126 = tpu.reciprocal %125 {approx = true} : vector<8x1xf32> -> vector<8x1xf32>
    %127 = vector.broadcast %126 : vector<8x1xf32> to vector<8x8xf32>
    %128 = arith.mulf %123, %127 : vector<8x8xf32>
    %129 = arith.truncf %128 : vector<8x8xf32> to vector<8x8xbf16>
    %cst_50 = arith.constant dense<0.000000e+00> : vector<8x8xf32>
    %130 = tpu.matmul %129, %116, %cst_50 {dimension_numbers = #tpu.dot_dimension_numbers<[1], [0], [0], [1], [0, 0, 1, 1], [], []>} : vector<8x8xbf16>, vector<8x8xbf16>, vector<8x8xf32> -> vector<8x8xf32>
    %c0_51 = arith.constant 0 : index
    %c24 = arith.constant 24 : index
    %131 = vector.load %arg16[%c0_51, %c24] : memref<8x32xf32, #tpu.memory_space<vmem>>, vector<8x8xf32>
    tpu.vector_store %arg16[%c0_51, %c24], %130 {strides = array<i32>} : memref<8x32xf32, #tpu.memory_space<vmem>>, vector<8x8xf32>,
    %c0_52 = arith.constant 0 : index
    %c0_53 = arith.constant 0 : index
    %132 = vector.load %arg16[%c0_52, %c0_53] : memref<8x32xf32, #tpu.memory_space<vmem>>, vector<8x32xf32>
    %133 = arith.truncf %132 : vector<8x32xf32> to vector<8x32xbf16>
    %134 = arith.extf %1 : vector<8x32xbf16> to vector<8x32xf32>
    %c0_54 = arith.constant 0 : index
    %c0_55 = arith.constant 0 : index
    %135 = vector.load %arg12[%c0_54, %c0_55] : memref<32x32xbf16, #tpu.memory_space<vmem>>, vector<32x32xbf16>
    %cst_56 = arith.constant dense<0.000000e+00> : vector<8x32xf32>
    %136 = tpu.matmul %133, %135, %cst_56 {dimension_numbers = #tpu.dot_dimension_numbers<[1], [0], [0], [1], [0, 0, 1, 1], [], []>} : vector<8x32xbf16>, vector<32x32xbf16>, vector<8x32xf32> -> vector<8x32xf32>
    %137 = arith.addf %134, %136 : vector<8x32xf32>
    %c0_57 = arith.constant 0 : index
    %c0_58 = arith.constant 0 : index
    %138 = vector.load %arg9[%c0_57, %c0_58] : memref<1x32xbf16, #tpu.memory_space<vmem>>, vector<1x32xbf16>
    %139 = arith.mulf %137, %137 : vector<8x32xf32>
    %cst_59 = arith.constant dense<0.000000e+00> : vector<8xf32>
    %140 = vector.multi_reduction <add>, %139, %cst_59 [1] : vector<8x32xf32> to vector<8xf32>
    %141 = vector.shape_cast %140 : vector<8xf32> to vector<8x1xf32>
    %cst_60 = arith.constant 3.200000e+01 : f32
    %142 = vector.broadcast %cst_60 : f32 to vector<8x1xf32>
    %143 = arith.divf %141, %142 : vector<8x1xf32>
    %cst_61 = arith.constant 9.99999997E-7 : f32
    %144 = vector.broadcast %cst_61 : f32 to vector<8x1xf32>
    %145 = arith.addf %143, %144 : vector<8x1xf32>
    %146 = math.rsqrt %145 : vector<8x1xf32>
    %147 = vector.broadcast %146 : vector<8x1xf32> to vector<8x32xf32>
    %148 = arith.mulf %137, %147 : vector<8x32xf32>
    %149 = arith.extf %138 : vector<1x32xbf16> to vector<1x32xf32>
    %150 = vector.broadcast %149 : vector<1x32xf32> to vector<8x32xf32>
    %151 = arith.mulf %148, %150 : vector<8x32xf32>
    %152 = arith.truncf %151 : vector<8x32xf32> to vector<8x32xbf16>
    %c0_62 = arith.constant 0 : index
    %c0_63 = arith.constant 0 : index
    %153 = vector.load %arg13[%c0_62, %c0_63] : memref<32x128xbf16, #tpu.memory_space<vmem>>, vector<32x128xbf16>
    %cst_64 = arith.constant dense<0.000000e+00> : vector<8x128xf32>
    %154 = tpu.matmul %152, %153, %cst_64 {dimension_numbers = #tpu.dot_dimension_numbers<[1], [0], [0], [1], [0, 0, 1, 1], [], []>} : vector<8x32xbf16>, vector<32x128xbf16>, vector<8x128xf32> -> vector<8x128xf32>
    %155 = vector.extract_strided_slice %154 {offsets = [0, 0], sizes = [8, 64], strides = [1, 1]} : vector<8x128xf32> to vector<8x64xf32>
    %156 = vector.extract_strided_slice %154 {offsets = [0, 64], sizes = [8, 64], strides = [1, 1]} : vector<8x128xf32> to vector<8x64xf32>
    %157 = arith.negf %155 : vector<8x64xf32>
    %158 = math.exp %157 : vector<8x64xf32>
    %cst_65 = arith.constant 1.000000e+00 : f32
    %159 = vector.broadcast %cst_65 : f32 to vector<8x64xf32>
    %160 = arith.addf %159, %158 : vector<8x64xf32>
    %161 = arith.divf %159, %160 : vector<8x64xf32>
    %162 = arith.mulf %155, %161 : vector<8x64xf32>
    %163 = arith.mulf %162, %156 : vector<8x64xf32>
    %164 = arith.truncf %163 : vector<8x64xf32> to vector<8x64xbf16>
    %c0_66 = arith.constant 0 : index
    %c0_67 = arith.constant 0 : index
    %165 = vector.load %arg14[%c0_66, %c0_67] : memref<64x32xbf16, #tpu.memory_space<vmem>>, vector<64x32xbf16>
    %cst_68 = arith.constant dense<0.000000e+00> : vector<8x32xf32>
    %166 = tpu.matmul %164, %165, %cst_68 {dimension_numbers = #tpu.dot_dimension_numbers<[1], [0], [0], [1], [0, 0, 1, 1], [], []>} : vector<8x64xbf16>, vector<64x32xbf16>, vector<8x32xf32> -> vector<8x32xf32>
    %167 = arith.addf %137, %166 : vector<8x32xf32>
    %168 = arith.truncf %167 : vector<8x32xf32> to vector<8x32xbf16>
    %c0_69 = arith.constant 0 : index
    %c0_70 = arith.constant 0 : index
    %c0_71 = arith.constant 0 : index
    %169 = vector.load %arg15[%c0_69, %c0_70, %c0_71] : memref<1x8x32xbf16, #tpu.memory_space<vmem>>, vector<1x8x32xbf16>
    %170 = vector.shape_cast %169 : vector<1x8x32xbf16> to vector<8x32xbf16>
    %171 = vector.shape_cast %168 : vector<8x32xbf16> to vector<1x8x32xbf16>
    tpu.vector_store %arg15[%c0_69, %c0_70, %c0_71], %171 {strides = array<i32>} : memref<1x8x32xbf16, #tpu.memory_space<vmem>>, vector<1x8x32xbf16>,
    return
  }
  func.func @transform_0(%arg0: i32) -> (i32, i32, i32) {
    %c0_i32 = arith.constant 0 : i32
    %c0_i32_0 = arith.constant 0 : i32
    %c0_i32_1 = arith.constant 0 : i32
    return %arg0, %c0_i32, %c0_i32_0 : i32, i32, i32
  }
  func.func @transform_1(%arg0: i32) -> (i32, i32, i32) {
    %c0_i32 = arith.constant 0 : i32
    %c0_i32_0 = arith.constant 0 : i32
    %c0_i32_1 = arith.constant 0 : i32
    return %arg0, %c0_i32, %c0_i32_0 : i32, i32, i32
  }
  func.func @transform_2(%arg0: i32) -> (i32, i32, i32, i32) {
    %c0_i32 = arith.constant 0 : i32
    %c0_i32_0 = arith.constant 0 : i32
    %c0_i32_1 = arith.constant 0 : i32
    %c0_i32_2 = arith.constant 0 : i32
    return %arg0, %c0_i32, %c0_i32_0, %c0_i32_1 : i32, i32, i32, i32
  }
  func.func @transform_3(%arg0: i32) -> (i32, i32) {
    %c0_i32 = arith.constant 0 : i32
    %c0_i32_0 = arith.constant 0 : i32
    %c0_i32_1 = arith.constant 0 : i32
    return %c0_i32, %c0_i32_0 : i32, i32
  }
  func.func @transform_4(%arg0: i32) -> (i32, i32) {
    %c0_i32 = arith.constant 0 : i32
    %c0_i32_0 = arith.constant 0 : i32
    %c0_i32_1 = arith.constant 0 : i32
    return %c0_i32, %c0_i32_0 : i32, i32
  }
  func.func @transform_5(%arg0: i32) -> (i32, i32) {
    %c0_i32 = arith.constant 0 : i32
    %c0_i32_0 = arith.constant 0 : i32
    %c0_i32_1 = arith.constant 0 : i32
    return %c0_i32, %c0_i32_0 : i32, i32
  }
  func.func @transform_6(%arg0: i32) -> (i32, i32) {
    %c0_i32 = arith.constant 0 : i32
    %c0_i32_0 = arith.constant 0 : i32
    %c0_i32_1 = arith.constant 0 : i32
    return %c0_i32, %c0_i32_0 : i32, i32
  }
  func.func @transform_7(%arg0: i32) -> (i32, i32) {
    %c0_i32 = arith.constant 0 : i32
    %c0_i32_0 = arith.constant 0 : i32
    %c0_i32_1 = arith.constant 0 : i32
    return %c0_i32, %c0_i32_0 : i32, i32
  }
  func.func @transform_8(%arg0: i32) -> (i32, i32) {
    %c0_i32 = arith.constant 0 : i32
    %c0_i32_0 = arith.constant 0 : i32
    %c0_i32_1 = arith.constant 0 : i32
    return %c0_i32, %c0_i32_0 : i32, i32
  }
  func.func @transform_9(%arg0: i32) -> (i32, i32) {
    %c0_i32 = arith.constant 0 : i32
    %c0_i32_0 = arith.constant 0 : i32
    %c0_i32_1 = arith.constant 0 : i32
    return %c0_i32, %c0_i32_0 : i32, i32
  }
  func.func @transform_10(%arg0: i32) -> (i32, i32) {
    %c0_i32 = arith.constant 0 : i32
    %c0_i32_0 = arith.constant 0 : i32
    %c0_i32_1 = arith.constant 0 : i32
    return %c0_i32, %c0_i32_0 : i32, i32
  }
  func.func @transform_11(%arg0: i32) -> (i32, i32) {
    %c0_i32 = arith.constant 0 : i32
    %c0_i32_0 = arith.constant 0 : i32
    %c0_i32_1 = arith.constant 0 : i32
    return %c0_i32, %c0_i32_0 : i32, i32
  }
  func.func @transform_12(%arg0: i32) -> (i32, i32) {
    %c0_i32 = arith.constant 0 : i32
    %c0_i32_0 = arith.constant 0 : i32
    %c0_i32_1 = arith.constant 0 : i32
    return %c0_i32, %c0_i32_0 : i32, i32
  }
  func.func @transform_13(%arg0: i32) -> (i32, i32) {
    %c0_i32 = arith.constant 0 : i32
    %c0_i32_0 = arith.constant 0 : i32
    %c0_i32_1 = arith.constant 0 : i32
    return %c0_i32, %c0_i32_0 : i32, i32
  }
  func.func @transform_14(%arg0: i32) -> (i32, i32, i32) {
    %c0_i32 = arith.constant 0 : i32
    %c0_i32_0 = arith.constant 0 : i32
    %c0_i32_1 = arith.constant 0 : i32
    return %arg0, %c0_i32, %c0_i32_0 : i32, i32, i32
  }
}

</mosaic_0001>

<bundles_post_ra>
// kernel: tile.15
= control target key start
LH: loop header
LB: loop body
LE: loop exit
PB: predicated region body
PF: predicated region fallthrough
CT: control target
= control target key end

     0   :  { %vm42_vm0 = vcmask 1047556   ;;  %vm44_vm1 = vcmask 64512   ;;  %s93_s22 = smov 8   ;;  %s94_s25 = smov 16   ;;  %vm54_vm2 = vcmask 261312   ;;  %vm64_vm3 = vcmask 195712   ;;  %s146_s0 = inlined_call_operand.vmem [shape: f32[8,4,8], index: 0, kind: input, shape index: {}]   ;;  %s147_s1 = inlined_call_operand.vmem [shape: f32[8,32], index: 1, kind: output, shape index: {}]  }
   0x1   :  { %v82_v0 = vld [vmem:[%s146_s0 + $0x1c] sm:$0xf]  ;;  %v83_v1 = vld [vmem:[%s146_s0 + $0x18] sm:$0xf]  ;;  %v84_v2 = vld [vmem:[%s146_s0 + $0x14] sm:$0xf] }
   0x2   :  { %8 = vst [vmem:[#allocation0 + $0x38] sm:$0xf] %v82_v0  ;;  %13 = vst [vmem:[#allocation0 + $0x30] sm:$0xf] %v83_v1  ;;  %v85_v3 = vld [vmem:[%s146_s0 + $0x10] sm:$0xf] }
   0x3   :  { %18 = vst [vmem:[#allocation0 + $0x28] sm:$0xf] %v84_v2  ;;  %v86_v4 = vld [vmem:[%s146_s0 + $0xc] sm:$0xf]  ;;  %v87_v5 = vld [vmem:[%s146_s0 + $0x8] sm:$0xf] }
   0x4   :  { %23 = vst [vmem:[#allocation0 + $0x20] sm:$0xf] %v85_v3  ;;  %28 = vst [vmem:[#allocation0 + $0x18] sm:$0xf] %v86_v4  ;;  %v88_v6 = vld [vmem:[%s146_s0 + $0x4] sm:$0xf] }
   0x5   :  { %33 = vst [vmem:[#allocation0 + $0x10] sm:$0xf] %v87_v5  ;;  %v38_v7 = vld [vmem:[%s146_s0] sm:$0xf]  ;;  %37 = vst [vmem:[#allocation0 + $0x8] sm:$0xf] %v88_v6 }
   0x6   :  { %39 = vst [vmem:[#allocation0] sm:$0xf] %v38_v7  ;;  %s92_s0 = smov 24   ;;  %vm74_vm4 = vcmask 130112  }
   0xb   :  { %v49_v8 = vld [vmem:[#allocation0 + $0x3] ss:$8 sm:$0xf0]   ;;  %v59_v9 = vld [vmem:[#allocation0 + $0x2] ss:$8 sm:$0xf0]  }
   0xc   :  { %v69_v14 = vld [vmem:[#allocation0 + $0x1] ss:$8 sm:$0xf0]   ;;  %v41_v17 = vld [vmem:[#allocation0] ss:$8 sm:$0xf0]  }
   0xd   :  { %v47_v10 = vld [vmem:[#allocation0 + $0x3] ss:$8 sm:$0xf]   ;;  %v57_v11 = vld [vmem:[#allocation0 + $0x2] ss:$8 sm:$0xf]  }
   0xe   :  { %v51_v12 = vsel %vm42_vm0, %v49_v8, %v47_v10  ;;  %v67_v13 = vld [vmem:[#allocation0 + $0x1] ss:$8 sm:$0xf]   ;;  %v40_v16 = vld [vmem:[#allocation0] ss:$8 sm:$0xf]   ;;  %v61_v18 = vsel %vm42_vm0, %v59_v9, %v57_v11 }
   0xf   :  { %52 = vrot.lane.b32.xlu0 %v51_v12, %s92_s0  ;;  %v71_v15 = vsel %vm42_vm0, %v69_v14, %v67_v13  ;;  %v43_v19 = vsel %vm42_vm0, %v41_v17, %v40_v16 }
  0x10   :  { %72 = vrot.lane.b32.xlu1 %v71_v15, %s93_s22  ;;  %45 = vst.msk [vmem:[%s147_s1] sm:$0xff] %vm44_vm1, %v43_v19  }
  0x13   :  { %62 = vrot.lane.b32.xlu0 %v61_v18, %s94_s25 }
  0x81   :  { %v53_v20 = vpop.permute.xlu0 %52  }
  0x82   :  { %55 = vst.msk [vmem:[%s147_s1] sm:$0xff] %vm54_vm2, %v53_v20   ;;  %v73_v21 = vpop.permute.xlu1 %72  }
  0x85   :  { %v63_v22 = vpop.permute.xlu0 %62  }
  0x86   :  { %65 = vst.msk [vmem:[%s147_s1] sm:$0xff] %vm64_vm3, %v63_v22  }
  0x87   :  { %75 = vst.msk [vmem:[%s147_s1] sm:$0xff] %vm74_vm4, %v73_v21  }

// kernel: tile.11
= control target key start
LH: loop header
LB: loop body
LE: loop exit
PB: predicated region body
PF: predicated region fallthrough
CT: control target
= control target key end

     0   :  { %s183_s0 = inlined_call_operand.vmem [shape: f32[8,4,8], index: 0, kind: input, shape index: {}]   ;;  %s184_s1 = inlined_call_operand.hbm [shape: f32[8,32], index: 1, kind: output, shape index: {}]  }
   0x1   :  { %v93_v0 = vld [vmem:[%s183_s0 + $0x1c] sm:$0xf]  ;;  %v94_v1 = vld [vmem:[%s183_s0 + $0x18] sm:$0xf]  ;;  %v95_v2 = vld [vmem:[%s183_s0 + $0x14] sm:$0xf] }
   0x2   :  { %9 = vst [vmem:[#allocation2 + $0x38] sm:$0xf] %v93_v0  ;;  %14 = vst [vmem:[#allocation2 + $0x30] sm:$0xf] %v94_v1  ;;  %v96_v3 = vld [vmem:[%s183_s0 + $0x10] sm:$0xf] }
   0x3   :  { %19 = vst [vmem:[#allocation2 + $0x28] sm:$0xf] %v95_v2  ;;  %v97_v4 = vld [vmem:[%s183_s0 + $0xc] sm:$0xf]  ;;  %v98_v5 = vld [vmem:[%s183_s0 + $0x8] sm:$0xf] }
   0x4   :  { %24 = vst [vmem:[#allocation2 + $0x20] sm:$0xf] %v96_v3  ;;  %29 = vst [vmem:[#allocation2 + $0x18] sm:$0xf] %v97_v4  ;;  %v99_v6 = vld [vmem:[%s183_s0 + $0x4] sm:$0xf] }
   0x5   :  { %34 = vst [vmem:[#allocation2 + $0x10] sm:$0xf] %v98_v5  ;;  %v39_v7 = vld [vmem:[%s183_s0] sm:$0xf]  ;;  %38 = vst [vmem:[#allocation2 + $0x8] sm:$0xf] %v99_v6 }
   0x6   :  { %40 = vst [vmem:[#allocation2] sm:$0xf] %v39_v7 }
   0x7   :  { %2 = vsyncpa [#allocation1], 0  ;;  %vm43_vm0 = vcmask 1047556   ;;  %vm45_vm1 = vcmask 64512   ;;  %s128_s0 = smov 24   ;;  %s129_s22 = smov 8  }
   0x8   :  { %s130_s23 = smov 16   ;;  %vm55_vm2 = vcmask 261312   ;;  %s131_s24 = smov [#allocation0]   ;;  %vm65_vm3 = vcmask 195712   ;;  %vm75_vm4 = vcmask 130112  }
   0x9   :  { %s81_s25 = sshll.u32 %s131_s24, 4  ;;  %s82_s25 = int_to_ptr.vmem [resolvable:$true] %s81_s25 }
   0xa   :  { %s104_s26 = scalar_lea.vmem %s82_s25, 128  ;;  %p109_p1 = scmp.lt.s32.totalorder %s82_s25, %s82_s25 }
   0xb   :  { %v50_v8 = vld [vmem:[#allocation2 + $0x3] ss:$8 sm:$0xf0]   ;;  %v60_v9 = vld [vmem:[#allocation2 + $0x2] ss:$8 sm:$0xf0]   ;;  %p105_p0 = scmp.ne.s32.totalorder %s82_s25, %s104_s26  ;;  %p110_p2 = scmp.lt.s32.totalorder %s104_s26, %s104_s26 }
   0xc   :  { %v70_v14 = vld [vmem:[#allocation2 + $0x1] ss:$8 sm:$0xf0]   ;;  %v42_v17 = vld [vmem:[#allocation2] ss:$8 sm:$0xf0]  }
   0xd   :  { %v48_v10 = vld [vmem:[#allocation2 + $0x3] ss:$8 sm:$0xf]   ;;  %v58_v11 = vld [vmem:[#allocation2 + $0x2] ss:$8 sm:$0xf]   ;;  %p111_p3 = por %p110_p2, %p109_p1 }
   0xe   :  { %v52_v12 = vsel %vm43_vm0, %v50_v8, %v48_v10  ;;  %v68_v13 = vld [vmem:[#allocation2 + $0x1] ss:$8 sm:$0xf]   ;;  %v41_v16 = vld [vmem:[#allocation2] ss:$8 sm:$0xf]   ;;  %v62_v18 = vsel %vm43_vm0, %v60_v9, %v58_v11 }
   0xf   :  { %53 = vrot.lane.b32.xlu0 %v52_v12, %s128_s0  ;;  %v72_v15 = vsel %vm43_vm0, %v70_v14, %v68_v13  ;;  %v44_v19 = vsel %vm43_vm0, %v42_v17, %v41_v16  ;;  %p112_p4 = pnand %p111_p3, %p105_p0 }
  0x10   :  { %73 = vrot.lane.b32.xlu1 %v72_v15, %s129_s22  ;;  %46 = vst.msk [vmem:[#allocation0] sm:$0xff] %vm45_vm1, %v44_v19  }
  0x13   :  { %63 = vrot.lane.b32.xlu0 %v62_v18, %s130_s23 }
  0x81   :  { %v54_v20 = vpop.permute.xlu0 %53  }
  0x82   :  { %56 = vst.msk [vmem:[#allocation0] sm:$0xff] %vm55_vm2, %v54_v20   ;;  %v74_v21 = vpop.permute.xlu1 %73  }
  0x85   :  { %v64_v22 = vpop.permute.xlu0 %63  }
  0x86   :  { %66 = vst.msk [vmem:[#allocation0] sm:$0xff] %vm65_vm3, %v64_v22  }
  0x87   :  { %76 = vst.msk [vmem:[#allocation0] sm:$0xff] %vm75_vm4, %v74_v21  }
  0x88   :  { %115 = shalt.err (!%p112_p4)
}
  0x89   :  { %s116_s29 = scalar_lea.hbm %s184_s1, 128 }
  0x8a   :  { %p117_p5 = scmp.ne.s32.totalorder %s184_s1, %s116_s29  ;;  %p120_p6 = scmp.lt.u32.totalorder %s116_s29, %s184_s1 }
  0x8c   :  { %p122_p7 = pnand %p120_p6, %p117_p5 }
  0x8e   :  { %125 = shalt.err (!%p122_p7)
}
  0x8f   :  { %84 = dma.vmem_to_hbm [thread:$0]  %s82_s25, 128, %s184_s1, [#allocation1]  }
  0x90   :  { %126 = dma.done.wait [#allocation1], 128  }
  0x91   :  { %127 = vsyncadd [#allocation1], 4294967168 }
  0x92   :  { %86 = vsyncpa [#allocation1], 1 }

// kernel: grad_maker_layer_forward.1
= control target key start
LH: loop header
LB: loop body
LE: loop exit
PB: predicated region body
PF: predicated region fallthrough
CT: control target
= control target key end

     0   :  { %s3458_s0 = inlined_call_operand.hbm [shape: bf16[2,8,32], index: 0, kind: input, shape index: {}]   ;;  %s3459_s1 = inlined_call_operand.hbm [shape: bf16[2,8,32], index: 1, kind: input, shape index: {}]   ;;  %s3460_s2 = inlined_call_operand.hbm [shape: bf16[2,1,8,8], index: 2, kind: input, shape index: {}]   ;;  %s3461_s3 = inlined_call_operand.hbm [shape: f32[8,32], index: 3, kind: input, shape index: {}]   ;;  %s3462_s4 = inlined_call_operand.hbm [shape: f32[8,32], index: 4, kind: input, shape index: {}]   ;;  %s3463_s5 = inlined_call_operand.hbm [shape: f32[8,32], index: 5, kind: input, shape index: {}]   ;;  %s3464_s6 = inlined_call_operand.hbm [shape: bf16[1,32], index: 6, kind: input, shape index: {}]   ;;  %s3465_s7 = inlined_call_operand.hbm [shape: bf16[1,32], index: 7, kind: input, shape index: {}]   ;;  %s3466_s8 = inlined_call_operand.hbm [shape: bf16[1,32], index: 8, kind: input, shape index: {}]   ;;  %s3467_s9 = inlined_call_operand.hbm [shape: bf16[32,32], index: 9, kind: input, shape index: {}]   ;;  %s3468_s10 = inlined_call_operand.hbm [shape: bf16[32,64], index: 10, kind: input, shape index: {}]   ;;  %s3469_s11 = inlined_call_operand.hbm [shape: bf16[32,32], index: 11, kind: input, shape index: {}]   ;;  %s3470_s12 = inlined_call_operand.hbm [shape: bf16[32,128], index: 12, kind: input, shape index: {}]   ;;  %s3471_s13 = inlined_call_operand.hbm [shape: bf16[64,32], index: 13, kind: input, shape index: {}]   ;;  %s3472_s14 = inlined_call_operand.hbm [shape: bf16[2,8,32], index: 14, kind: output, shape index: {}]  }
   0x1   :  { %3499 = sst [smem:[#allocation41_spill]] %s3458_s0 }
   0x2   :  { %3500 = sst [smem:[#allocation42_spill]] %s3459_s1 }
   0x3   :  { %3501 = sst [smem:[#allocation43_spill]] %s3460_s2 }
   0x4   :  { %3502 = sst [smem:[#allocation44_spill]] %s3461_s3 }
   0x5   :  { %3503 = sst [smem:[#allocation45_spill]] %s3462_s4 }
   0x6   :  { %3504 = sst [smem:[#allocation46_spill]] %s3463_s5 }
   0x7   :  { %3505 = sst [smem:[#allocation47_spill]] %s3464_s6 }
   0x8   :  { %3506 = sst [smem:[#allocation48_spill]] %s3465_s7 }
   0x9   :  { %3507 = sst [smem:[#allocation49_spill]] %s3467_s9 }
   0xa   :  { %3508 = sst [smem:[#allocation50_spill]] %s3469_s11 }
   0xb   :  { %3509 = sst [smem:[#allocation51_spill]] %s3471_s13 }
   0xc   :  { %3510 = sst [smem:[#allocation52_spill]] %s3472_s14 }
   0xd   :  { %19 = vsyncpa [#allocation4], 0 }
   0xe   :  { %21 = vsyncpa [#allocation4 + $0x1], 0 }
   0xf   :  { %22 = vsyncpa [#allocation7], 0 }
  0x10   :  { %24 = vsyncpa [#allocation7 + $0x1], 0 }
  0x11   :  { %25 = vsyncpa [#allocation10], 0 }
  0x12   :  { %26 = vsyncpa [#allocation13], 0 }
  0x13   :  { %27 = vsyncpa [#allocation16], 0 }
  0x14   :  { %28 = vsyncpa [#allocation19], 0 }
  0x15   :  { %29 = vsyncpa [#allocation22], 0 }
  0x16   :  { %30 = vsyncpa [#allocation25], 0 }
  0x17   :  { %31 = vsyncpa [#allocation5], 0 }
  0x18   :  { %33 = vsyncpa [#allocation5 + $0x1], 0  ;;  %s2838_s29 = smov 0   ;;  %s2840_s30 = smov 0  }
  0x19   :  { %s2842_s15 = smov 0   ;;  %s2844_s16 = smov 0  }
  0x1a LB: > { %3511 = sst [smem:[#allocation36_spill]] %s2726_s16  ;;  %s2728_s17 = smov [#allocation9]   ;;  %s2726_s16 = sphi %s2844_s16, %s3565_s16   ;;  %s2722_s15 = sphi %s2842_s15, %s3569_s15   ;;  %s2718_s30 = sphi %s2840_s30, %s3568_s30   ;;  %s2714_s29 = sphi %s2838_s29, %s3567_s29  }
  0x1b   : > { %s392_s18 = sshll.u32 %s2728_s17, 4  ;;  %s2859_s19 = sadd.s32 4294967295, %s2726_s16   ;;  %s2864_s18 = int_to_ptr.vmem [resolvable:$true] %s392_s18 }
  0x1c   : > { %p1819_p0 = scmp.ge.s32.totalorder %s2726_s16, 1  ;;  %p3478_p1 = scmp.eq.s32.totalorder %s2859_s19, 0 }
  0x1d   : > { %p379_p2 = scmp.lt.s32.totalorder %s2726_s16, 3  ;;  %s2729_s21 = smov [#allocation12]  }
  0x1e   : > { %s414_s22 = sshll.u32 %s2729_s21, 4  ;;  %s2730_s23 = smov [#allocation15]   ;;  %s2873_s22 = int_to_ptr.vmem [resolvable:$true] %s414_s22 }
  0x1f   : > { %p2866_p3 = pnand %p1819_p0, %p379_p2  ;;  %s436_s24 = sshll.u32 %s2730_s23, 4  ;;  %s2881_s24 = int_to_ptr.vmem [resolvable:$true] %s436_s24 }
  0x20   : > { %s2731_s26 = smov [#allocation18]   ;;  %s3515_s3 = sld [smem:[#allocation44_spill]] }
  0x21   : > { %s3512_s20 = scalar_select %p2866_p3, 1, 0 }
  0x22   : > { %p2061_p5 = pneg %p2866_p3  ;;  %s2883_s27 = sshll.u32 %s2731_s26, 4  ;;  %s458_s27 = int_to_ptr.vmem [resolvable:$true] %s2883_s27 }
  0x23   : > { %3513 = sst [smem:[#allocation37_spill]] %s3512_s20 }
  0x24   : > { %p2877_p6 = pnand %p2061_p5, %p3478_p1 }
  0x26   : > { %s3514_s25 = scalar_select %p2877_p6, 1, 0 }
  0x27   : > { %s2234_s14 = scalar_lea.hbm %s3515_s3, 128  ;;  %p2893_p8 = pneg %p2877_p6 }
  0x28   : > { %p2235_p7 = scmp.ne.s32.totalorder %s3515_s3, %s2234_s14  ;;  %p2241_p11 = scmp.lt.u32.totalorder %s2234_s14, %s3515_s3 }
  0x29   : > { %s3516_s23 = scalar_select %p2893_p8, 1, 0 }
  0x2a   : > { %p2237_p9 = pnand %p2893_p8, %p2235_p7 }
  0x2c   : > { %p2238_p10 = pneg %p2237_p9 }
  0x2e   : > { %p2243_p12 = pnand %p2241_p11, %p2238_p10 }
  0x30   : > { %2246 = shalt.err (!%p2243_p12)
}
  0x31   : > { %s2247_s20 = scalar_lea.vmem %s2864_s18, 128  ;;  %p2255_p5 = scmp.lt.s32.totalorder %s2864_s18, %s2864_s18 }
  0x32   : > { %p2248_p13 = scmp.ne.s32.totalorder %s2864_s18, %s2247_s20  ;;  %p2256_p4 = scmp.lt.s32.totalorder %s2247_s20, %s2247_s20 }
  0x34   : > { %p2250_p0 = pnand %p2248_p13, %p2893_p8  ;;  %p2257_p7 = por %p2256_p4, %p2255_p5 }
  0x36   : > { %p2251_p2 = pneg %p2250_p0 }
  0x38   : > { %p2258_p9 = pnand %p2257_p7, %p2251_p2 }
  0x3a   : > { %2261 = shalt.err (!%p2258_p9)
}
  0x3b   : > { %2064 = dma.hbm_to_vmem [thread:$0]  (!%p2877_p6), %s3515_s3, 128, %s2864_s18, [#allocation10]  }
  0x3c   : > { %s3517_s5 = sld [smem:[#allocation46_spill]] }
  0x42   : > { %s2262_s21 = scalar_lea.hbm %s3517_s5, 128 }
  0x43   : > { %p2263_p10 = scmp.ne.s32.totalorder %s3517_s5, %s2262_s21  ;;  %p2269_p12 = scmp.lt.u32.totalorder %s2262_s21, %s3517_s5 }
  0x45   : > { %p2265_p4 = pnand %p2263_p10, %p2893_p8 }
  0x47   : > { %p2266_p11 = pneg %p2265_p4 }
  0x49   : > { %p2271_p13 = pnand %p2269_p12, %p2266_p11 }
  0x4b   : > { %2274 = shalt.err (!%p2271_p13)
}
  0x4c   : > { %s2275_s18 = scalar_lea.vmem %s2873_s22, 128  ;;  %p2283_p7 = scmp.lt.s32.totalorder %s2873_s22, %s2873_s22 }
  0x4d   : > { %p2276_p0 = scmp.ne.s32.totalorder %s2873_s22, %s2275_s18  ;;  %p2284_p9 = scmp.lt.s32.totalorder %s2275_s18, %s2275_s18 }
  0x4f   : > { %p2278_p2 = pnand %p2276_p0, %p2893_p8  ;;  %p2285_p10 = por %p2284_p9, %p2283_p7 }
  0x51   : > { %p2279_p5 = pneg %p2278_p2 }
  0x53   : > { %p2286_p4 = pnand %p2285_p10, %p2279_p5 }
  0x55   : > { %2289 = shalt.err (!%p2286_p4)
}
  0x56   : > { %2070 = dma.hbm_to_vmem [thread:$0]  (!%p2877_p6), %s3517_s5, 128, %s2873_s22, [#allocation13]  }
  0x57   : > { %s3518_s7 = sld [smem:[#allocation48_spill]] }
  0x5d   : > { %s2290_s28 = scalar_lea.hbm %s3518_s7, 16 }
  0x5e   : > { %p2291_p11 = scmp.ne.s32.totalorder %s3518_s7, %s2290_s28  ;;  %p2297_p0 = scmp.lt.u32.totalorder %s2290_s28, %s3518_s7 }
  0x60   : > { %p2293_p12 = pnand %p2291_p11, %p2893_p8 }
  0x62   : > { %p2294_p13 = pneg %p2293_p12 }
  0x64   : > { %p2299_p2 = pnand %p2297_p0, %p2294_p13 }
  0x66   : > { %2302 = shalt.err (!%p2299_p2)
}
  0x67   : > { %s2303_s22 = scalar_lea.vmem %s2881_s24, 16  ;;  %s2310_s18 = scalar_lea.vmem %s2881_s24, 32 }
  0x68   : > { %p2304_p5 = scmp.ne.s32.totalorder %s2881_s24, %s2303_s22  ;;  %p2311_p10 = scmp.lt.s32.totalorder %s2881_s24, %s2881_s24 }
  0x69   : > { %p2312_p4 = scmp.lt.s32.totalorder %s2310_s18, %s2303_s22 }
  0x6a   : > { %p2306_p7 = pnand %p2304_p5, %p2893_p8 }
  0x6b   : > { %p2313_p11 = por %p2312_p4, %p2311_p10 }
  0x6c   : > { %p2307_p9 = pneg %p2306_p7 }
  0x6e   : > { %p2314_p12 = pnand %p2313_p11, %p2307_p9 }
  0x70   : > { %2317 = shalt.err (!%p2314_p12)
}
  0x71   : > { %2076 = dma.hbm_to_vmem [thread:$0]  (!%p2877_p6), %s3518_s7, 16, %s2881_s24, [#allocation16]  }
  0x72   : > { %s3519_s9 = sld [smem:[#allocation49_spill]] }
  0x78   : > { %s2318_s28 = scalar_lea.hbm %s3519_s9, 256 }
  0x79   : > { %p2319_p13 = scmp.ne.s32.totalorder %s3519_s9, %s2318_s28  ;;  %p2325_p5 = scmp.lt.u32.totalorder %s2318_s28, %s3519_s9 }
  0x7b   : > { %p2321_p0 = pnand %p2319_p13, %p2893_p8 }
  0x7d   : > { %p2322_p2 = pneg %p2321_p0 }
  0x7f   : > { %p2327_p7 = pnand %p2325_p5, %p2322_p2 }
  0x81   : > { %2330 = shalt.err (!%p2327_p7)
}
  0x82   : > { %s2331_s22 = scalar_lea.vmem %s458_s27, 256  ;;  %p2339_p11 = scmp.lt.s32.totalorder %s458_s27, %s458_s27 }
  0x83   : > { %p2332_p9 = scmp.ne.s32.totalorder %s458_s27, %s2331_s22  ;;  %p2340_p12 = scmp.lt.s32.totalorder %s2331_s22, %s2331_s22 }
  0x85   : > { %p2334_p10 = pnand %p2332_p9, %p2893_p8  ;;  %p2341_p1 = por %p2340_p12, %p2339_p11 }
  0x87   : > { %p2335_p4 = pneg %p2334_p10 }
  0x89   : > { %p2342_p3 = pnand %p2341_p1, %p2335_p4 }
  0x8b   : > { %2345 = shalt.err (!%p2342_p3)
}
  0x8c   : > { %s3480_s24 = smov 64   ;;  %s3483_s18 = smov 4  }
  0x8d   : > { %2082 = dma.hbm_to_vmem [thread:$0]  (!%p2877_p6), %s3519_s9, 256, %s458_s27, [#allocation19], %s3480_s24, %s3480_s24, %s3483_s18  }
  0x8e   : > { %s2734_s2 = smov [#allocation21]   ;;  %s3520_s11 = sld [smem:[#allocation50_spill]] }
  0x8f   : > { %s483_s14 = sshll.u32 %s2734_s2, 4  ;;  %s484_s14 = int_to_ptr.vmem [resolvable:$true] %s483_s14 }
  0x94   : > { %s2346_s21 = scalar_lea.hbm %s3520_s11, 256 }
  0x95   : > { %p2347_p1 = scmp.ne.s32.totalorder %s3520_s11, %s2346_s21  ;;  %p2353_p0 = scmp.lt.u32.totalorder %s2346_s21, %s3520_s11 }
  0x97   : > { %p2349_p3 = pnand %p2347_p1, %p2893_p8 }
  0x99   : > { %p2350_p13 = pneg %p2349_p3 }
  0x9b   : > { %p2355_p2 = pnand %p2353_p0, %p2350_p13 }
  0x9d   : > { %2358 = shalt.err (!%p2355_p2)
}
  0x9e   : > { %s2359_s27 = scalar_lea.vmem %s484_s14, 256  ;;  %p2367_p10 = scmp.lt.s32.totalorder %s484_s14, %s484_s14 }
  0x9f   : > { %p2360_p5 = scmp.ne.s32.totalorder %s484_s14, %s2359_s27  ;;  %p2368_p4 = scmp.lt.s32.totalorder %s2359_s27, %s2359_s27 }
  0xa1   : > { %p2362_p7 = pnand %p2360_p5, %p2893_p8  ;;  %p2369_p11 = por %p2368_p4, %p2367_p10 }
  0xa3   : > { %p2363_p9 = pneg %p2362_p7 }
  0xa5   : > { %p2370_p12 = pnand %p2369_p11, %p2363_p9 }
  0xa7   : > { %2373 = shalt.err (!%p2370_p12)
}
  0xa8   : > { %2088 = dma.hbm_to_vmem [thread:$0]  (!%p2877_p6), %s3520_s11, 256, %s484_s14, [#allocation22], %s3480_s24, %s3480_s24, %s3483_s18  }
  0xa9   : > { %s1818_s13 = sadd.s32 4294967294, %s2726_s16   ;;  %s3006_s2 = sadd.s32 1, %s2726_s16  }
  0xaa   : > { %3521 = sst [smem:[#allocation38_spill]] %s3006_s2  ;;  %s46_s28 = sadd.s32 1, %s2722_s15 }
  0xab   : > { %s43_s17 = ssub.s32 %s2726_s16, %s3006_s2  ;;  %p53_p1 = scmp.ne.s32.totalorder %s2722_s15, %s2718_s30 }
  0xac   : > { %p44_p3 = scmp.eq.s32.totalorder %s43_s17, 0  ;;  %p54_p13 = scmp.eq.s32.totalorder %s2726_s16, 0 }
  0xad   : > { %p59_p0 = scmp.ne.s32.totalorder %s2718_s30, %s2714_s29  ;;  %p366_p2 = scmp.eq.s32.totalorder %s2859_s19, 1 }
  0xae   : > { %s3018_s21 = scalar_select %p44_p3, %s2722_s15, %s46_s28  }
  0xaf   : > { %p55_p5 = por %p54_p13, %p53_p1  ;;  %p3523_p7 = scmp.eq.s32.totalorder %s2859_s19, 0 }
  0xb0   : > { %3522 = sst [smem:[#allocation39_spill]] %s3018_s21  ;;  %p3026_p10 = por %p366_p2, %p53_p1 }
  0xb1   : > { %p3022_p9 = por %p3523_p7, %p59_p0  ;;  %p372_p4 = scmp.eq.s32.totalorder %s1818_s13, 1 }
  0xb2   : > { %s3525_s26 = scalar_select %p3026_p10, 1, 0 }
  0xb3   : > { %s3524_s14 = scalar_select %p3022_p9, 1, 0 }
  0xb4   : > { %p2120_p11 = scmp.lt.s32.totalorder %s2726_s16, 2  ;;  %s3482_s20 = sand.u32 1, %s2722_s15  }
  0xb5   : > { %p3032_p12 = por %p372_p4, %p59_p0  ;;  %s3038_s27 = sshll.u32 %s3482_s20, 2 }
  0xb6   : > { %s3041_s3 = sshll.u32 %s2726_s16, 6  ;;  %p3043_p3 = pnand %p2120_p11, %p55_p5 }
  0xb7   : > { %s3526_s22 = scalar_select %p3032_p12, 1, 0 }
  0xb8   : > { %s3528_s0 = scalar_select %p3043_p3, 1, 0 }
  0xb9   : > { %3527 = sst [smem:[#allocation40_spill]] %s3526_s22  ;;  %s541_s28 = sand.u32 1, %s2726_s16  }
  0xba   : > { %s3529_s1 = sld [smem:[#allocation42_spill]]  ;;  %s545_s20 = scalar_lea.vmem [#allocation6], %s3038_s27 }
  0xbb   : > { %s552_s18 = sshll.u32 %s545_s20, 4  ;;  %s3057_s5 = scalar_lea.sflag [#allocation7], %s541_s28  ;;  %s3055_s18 = int_to_ptr.vmem [resolvable:$true] %s552_s18 }
  0xbc   : > { %p3063_p13 = pneg %p3043_p3 }
  0xbe   : > { %s3530_s9 = scalar_select %p3063_p13, 1, 0 }
  0xc0   : > { %s3052_s24 = scalar_lea.hbm %s3529_s1, %s3041_s3  ;;  %s2379_s11 = scalar_lea.hbm %s3529_s1, 128 }
  0xc1   : > { %s2374_s7 = scalar_lea.hbm %s3052_s24, 64  ;;  %p2380_p5 = scmp.lt.u32.totalorder %s3052_s24, %s3529_s1 }
  0xc2   : > { %p2375_p1 = scmp.ne.s32.totalorder %s3052_s24, %s2374_s7  ;;  %p2381_p7 = scmp.lt.u32.totalorder %s2379_s11, %s2374_s7 }
  0xc3   : > { %p2383_p11 = scmp.lt.u32.totalorder %s2374_s7, %s3052_s24 }
  0xc4   : > { %p2377_p0 = pnand %p3063_p13, %p2375_p1  ;;  %p2382_p4 = por %p2381_p7, %p2380_p5 }
  0xc6   : > { %p2378_p2 = pneg %p2377_p0  ;;  %p2384_p12 = por %p2383_p11, %p2382_p4 }
  0xc8   : > { %p2385_p10 = pnand %p2384_p12, %p2378_p2 }
  0xca   : > { %2388 = shalt.err (!%p2385_p10)
}
  0xcb   : > { %s2389_s28 = scalar_lea.vmem %s3055_s18, 64  ;;  %s2735_s13 = smov [#allocation6]  }
  0xcc   : > { %p2390_p1 = scmp.ne.s32.totalorder %s3055_s18, %s2389_s28  ;;  %s2394_s17 = sshll.u32 %s2735_s13, 4  ;;  %s2395_s17 = int_to_ptr.vmem [resolvable:$false] %s2394_s17 }
  0xcd   : > { %s2396_s21 = scalar_lea.vmem %s2395_s17, 128  ;;  %p2397_p6 = scmp.lt.s32.totalorder %s3055_s18, %s2395_s17 }
  0xce   : > { %p2392_p0 = pnand %p2390_p1, %p3063_p13  ;;  %p2398_p8 = scmp.lt.s32.totalorder %s2396_s21, %s2389_s28 }
  0xd0   : > { %p2393_p9 = pneg %p2392_p0  ;;  %p2399_p5 = por %p2398_p8, %p2397_p6 }
  0xd2   : > { %p2400_p7 = pnand %p2399_p5, %p2393_p9 }
  0xd4   : > { %2403 = shalt.err (!%p2400_p7)
}
  0xd5   : > { %2101 = dma.hbm_to_vmem [thread:$0]  (!%p3043_p3), %s3052_s24, 64, %s3055_s18, %s3057_s5  }
  0xd6   : > { %s2736_s7 = smov [#allocation11]   ;;  %s2737_s20 = smov [#allocation14]  }
  0xd7   : > { %s403_s11 = sshll.u32 %s2736_s7, 4  ;;  %s425_s1 = sshll.u32 %s2737_s20, 4  ;;  %s404_s11 = int_to_ptr.vmem [resolvable:$true] %s403_s11  ;;  %s426_s1 = int_to_ptr.vmem [resolvable:$true] %s425_s1 }
  0xd8   : > { %s3531_s4 = sld [smem:[#allocation45_spill]]  ;;  %p3532_p8 = scmp.ne.s32.totalorder %s3516_s23, 0 }
  0xde   : > { %s2404_s17 = scalar_lea.hbm %s3531_s4, 128 }
  0xdf   : > { %p2405_p6 = scmp.ne.s32.totalorder %s3531_s4, %s2404_s17  ;;  %p2411_p12 = scmp.lt.u32.totalorder %s2404_s17, %s3531_s4 }
  0xe1   : > { %p2407_p9 = pnand %p2405_p6, %p3532_p8 }
  0xe3   : > { %p2408_p10 = pneg %p2407_p9 }
  0xe5   : > { %p2413_p2 = pnand %p2411_p12, %p2408_p10 }
  0xe7   : > { %2416 = shalt.err (!%p2413_p2)
}
  0xe8   : > { %s2417_s24 = scalar_lea.vmem %s404_s11, 128  ;;  %p2425_p0 = scmp.lt.s32.totalorder %s404_s11, %s404_s11 }
  0xe9   : > { %p2418_p4 = scmp.ne.s32.totalorder %s404_s11, %s2417_s24  ;;  %p2426_p5 = scmp.lt.s32.totalorder %s2417_s24, %s2417_s24 }
  0xeb   : > { %p2420_p11 = pnand %p2418_p4, %p3532_p8  ;;  %p2427_p7 = por %p2426_p5, %p2425_p0 }
  0xed   : > { %p2421_p1 = pneg %p2420_p11 }
  0xef   : > { %p2428_p3 = pnand %p2427_p7, %p2421_p1 }
  0xf1   : > { %2431 = shalt.err (!%p2428_p3)
}
  0xf2   : > { %p3533_p6 = scmp.ne.s32.totalorder %s3514_s25, 0  ;;  %s3534_s6 = sld [smem:[#allocation47_spill]] }
  0xf4   : > { %2067 = dma.hbm_to_vmem [thread:$0]  (!%p3533_p6), %s3531_s4, 128, %s404_s11, [#allocation10]  }
  0xf8   : > { %s2432_s7 = scalar_lea.hbm %s3534_s6, 16 }
  0xf9   : > { %p2433_p9 = scmp.ne.s32.totalorder %s3534_s6, %s2432_s7  ;;  %p2439_p3 = scmp.lt.u32.totalorder %s2432_s7, %s3534_s6 }
  0xfb   : > { %p2435_p10 = pnand %p2433_p9, %p3532_p8 }
  0xfd   : > { %p2436_p12 = pneg %p2435_p10 }
  0xff   : > { %p2441_p2 = pnand %p2439_p3, %p2436_p12 }
 0x101   : > { %2444 = shalt.err (!%p2441_p2)
}
 0x102   : > { %s2445_s21 = scalar_lea.vmem %s426_s1, 16  ;;  %s2452_s11 = scalar_lea.vmem %s426_s1, 32 }
 0x103   : > { %p2446_p4 = scmp.ne.s32.totalorder %s426_s1, %s2445_s21  ;;  %p2453_p0 = scmp.lt.s32.totalorder %s426_s1, %s426_s1 }
 0x104   : > { %p2454_p5 = scmp.lt.s32.totalorder %s2452_s11, %s2445_s21 }
 0x105   : > { %p2448_p11 = pnand %p2446_p4, %p3532_p8 }
 0x106   : > { %p2455_p7 = por %p2454_p5, %p2453_p0 }
 0x107   : > { %p2449_p1 = pneg %p2448_p11 }
 0x109   : > { %p2456_p13 = pnand %p2455_p7, %p2449_p1 }
 0x10b   : > { %2459 = shalt.err (!%p2456_p13)
}
 0x10c   : > { %2073 = dma.hbm_to_vmem [thread:$0]  (!%p3533_p6), %s3534_s6, 16, %s426_s1, [#allocation13]  }
 0x10d   : > { %s2738_s2 = smov [#allocation17]   ;;  %s2739_s22 = smov [#allocation20]  }
 0x10e   : > { %s447_s16 = sshll.u32 %s2738_s2, 4  ;;  %s470_s7 = sshll.u32 %s2739_s22, 4  ;;  %s448_s16 = int_to_ptr.vmem [resolvable:$true] %s447_s16  ;;  %s471_s7 = int_to_ptr.vmem [resolvable:$true] %s470_s7 }
 0x10f   : > { %s2460_s17 = scalar_lea.hbm %s3466_s8, 16 }
 0x110   : > { %p2461_p13 = scmp.ne.s32.totalorder %s3466_s8, %s2460_s17  ;;  %p2467_p12 = scmp.lt.u32.totalorder %s2460_s17, %s3466_s8 }
 0x112   : > { %p2463_p9 = pnand %p2461_p13, %p3532_p8 }
 0x114   : > { %p2464_p10 = pneg %p2463_p9 }
 0x116   : > { %p2469_p3 = pnand %p2467_p12, %p2464_p10 }
 0x118   : > { %2472 = shalt.err (!%p2469_p3)
}
 0x119   : > { %s2473_s1 = scalar_lea.vmem %s448_s16, 16  ;;  %s2480_s18 = scalar_lea.vmem %s448_s16, 32 }
 0x11a   : > { %p2474_p2 = scmp.ne.s32.totalorder %s448_s16, %s2473_s1  ;;  %p2481_p1 = scmp.lt.s32.totalorder %s448_s16, %s448_s16 }
 0x11b   : > { %p2482_p0 = scmp.lt.s32.totalorder %s2480_s18, %s2473_s1 }
 0x11c   : > { %p2476_p4 = pnand %p2474_p2, %p3532_p8 }
 0x11d   : > { %p2483_p5 = por %p2482_p0, %p2481_p1 }
 0x11e   : > { %p2477_p11 = pneg %p2476_p4 }
 0x120   : > { %p2484_p7 = pnand %p2483_p5, %p2477_p11 }
 0x122   : > { %2487 = shalt.err (!%p2484_p7)
}
 0x123   : > { %2079 = dma.hbm_to_vmem [thread:$0]  (!%p3533_p6), %s3466_s8, 16, %s448_s16, [#allocation16]  }
 0x124   : > { %s2488_s17 = scalar_lea.hbm %s3468_s10, 256 }
 0x125   : > { %p2489_p13 = scmp.ne.s32.totalorder %s3468_s10, %s2488_s17  ;;  %p2495_p12 = scmp.lt.u32.totalorder %s2488_s17, %s3468_s10 }
 0x127   : > { %p2491_p9 = pnand %p2489_p13, %p3532_p8 }
 0x129   : > { %p2492_p10 = pneg %p2491_p9 }
 0x12b   : > { %p2497_p3 = pnand %p2495_p12, %p2492_p10 }
 0x12d   : > { %2500 = shalt.err (!%p2497_p3)
}
 0x12e   : > { %s2501_s1 = scalar_lea.vmem %s471_s7, 256  ;;  %p2509_p1 = scmp.lt.s32.totalorder %s471_s7, %s471_s7 }
 0x12f   : > { %p2502_p2 = scmp.ne.s32.totalorder %s471_s7, %s2501_s1  ;;  %p2510_p0 = scmp.lt.s32.totalorder %s2501_s1, %s2501_s1 }
 0x131   : > { %p2504_p4 = pnand %p2502_p2, %p3532_p8  ;;  %p2511_p5 = por %p2510_p0, %p2509_p1 }
 0x133   : > { %p2505_p11 = pneg %p2504_p4 }
 0x135   : > { %p2512_p7 = pnand %p2511_p5, %p2505_p11 }
 0x137   : > { %2515 = shalt.err (!%p2512_p7)
}
 0x138   : > { %s3535_s16 = smov 4   ;;  %s3536_s18 = smov 64  }
 0x139   : > { %2085 = dma.hbm_to_vmem [thread:$0]  (!%p3533_p6), %s3468_s10, 256, %s471_s7, [#allocation19], %s3536_s18, %s3536_s18, %s3535_s16  }
 0x13a   : > { %s2740_s20 = smov [#allocation23]   ;;  %s2741_s17 = smov [#allocation24]  }
 0x13b   : > { %s496_s13 = sshll.u32 %s2740_s20, 4  ;;  %s509_s28 = sshll.u32 %s2741_s17, 4  ;;  %s497_s13 = int_to_ptr.vmem [resolvable:$true] %s496_s13  ;;  %s510_s28 = int_to_ptr.vmem [resolvable:$true] %s509_s28 }
 0x13c   : > { %s2516_s24 = scalar_lea.hbm %s3470_s12, 256 }
 0x13d   : > { %p2517_p13 = scmp.ne.s32.totalorder %s3470_s12, %s2516_s24  ;;  %p2523_p12 = scmp.lt.u32.totalorder %s2516_s24, %s3470_s12 }
 0x13f   : > { %p2519_p9 = pnand %p2517_p13, %p3532_p8 }
 0x141   : > { %p2520_p10 = pneg %p2519_p9 }
 0x143   : > { %p2525_p3 = pnand %p2523_p12, %p2520_p10 }
 0x145   : > { %2528 = shalt.err (!%p2525_p3)
}
 0x146   : > { %s2529_s7 = scalar_lea.vmem %s497_s13, 256  ;;  %p2537_p1 = scmp.lt.s32.totalorder %s497_s13, %s497_s13 }
 0x147   : > { %p2530_p2 = scmp.ne.s32.totalorder %s497_s13, %s2529_s7  ;;  %p2538_p0 = scmp.lt.s32.totalorder %s2529_s7, %s2529_s7 }
 0x149   : > { %p2532_p4 = pnand %p2530_p2, %p3532_p8  ;;  %p2539_p5 = por %p2538_p0, %p2537_p1 }
 0x14b   : > { %p2533_p11 = pneg %p2532_p4 }
 0x14d   : > { %p2540_p7 = pnand %p2539_p5, %p2533_p11 }
 0x14f   : > { %2543 = shalt.err (!%p2540_p7)
}
 0x150   : > { %2091 = dma.hbm_to_vmem [thread:$0]  (!%p3533_p6), %s3470_s12, 256, %s497_s13, [#allocation22], %s3536_s18, %s3536_s18, %s3535_s16  }
 0x151   : > { %s3537_s17 = sld [smem:[#allocation51_spill]] }
 0x157   : > { %s2544_s21 = scalar_lea.hbm %s3537_s17, 512 }
 0x158   : > { %p2545_p13 = scmp.ne.s32.totalorder %s3537_s17, %s2544_s21  ;;  %p2551_p12 = scmp.lt.u32.totalorder %s2544_s21, %s3537_s17 }
 0x15a   : > { %p2547_p9 = pnand %p2545_p13, %p3532_p8 }
 0x15c   : > { %p2548_p10 = pneg %p2547_p9 }
 0x15e   : > { %p2553_p3 = pnand %p2551_p12, %p2548_p10 }
 0x160   : > { %2556 = shalt.err (!%p2553_p3)
}
 0x161   : > { %s2557_s7 = scalar_lea.vmem %s510_s28, 512  ;;  %p2565_p1 = scmp.lt.s32.totalorder %s510_s28, %s510_s28 }
 0x162   : > { %p2558_p2 = scmp.ne.s32.totalorder %s510_s28, %s2557_s7  ;;  %p2566_p0 = scmp.lt.s32.totalorder %s2557_s7, %s2557_s7 }
 0x164   : > { %p2560_p4 = pnand %p2558_p2, %p3532_p8  ;;  %p2567_p5 = por %p2566_p0, %p2565_p1 }
 0x166   : > { %p2561_p11 = pneg %p2560_p4 }
 0x168   : > { %p2568_p7 = pnand %p2567_p5, %p2561_p11 }
 0x16a   : > { %2571 = shalt.err (!%p2568_p7)
}
 0x16b   : > { %2094 = dma.hbm_to_vmem [thread:$0]  (!%p3533_p6), %s3537_s17, 512, %s510_s28, [#allocation25], %s3536_s18, %s3536_s18, %s3535_s16  }
 0x16c   : > { %s3538_s22 = sld [smem:[#allocation41_spill]]  ;;  %s527_s25 = scalar_lea.vmem [#allocation3], %s3038_s27 }
 0x16d   : > { %s534_s21 = sshll.u32 %s527_s25, 4  ;;  %s3539_s1 = sld [smem:[#allocation43_spill]]  ;;  %s3211_s21 = int_to_ptr.vmem [resolvable:$true] %s534_s21 }
 0x16e   : > { %s3540_s7 = sand.u32 1, %s2722_s15   ;;  %p3541_p6 = scmp.ne.s32.totalorder %s3530_s9, 0 }
 0x16f   : > { %s524_s16 = scalar_lea.sflag [#allocation4], %s3540_s7 }
 0x172   : > { %s3208_s20 = scalar_lea.hbm %s3538_s22, %s3041_s3  ;;  %s2577_s4 = scalar_lea.hbm %s3538_s22, 128 }
 0x173   : > { %s3217_s2 = scalar_lea.hbm %s3539_s1, %s3041_s3  ;;  %s2572_s18 = scalar_lea.hbm %s3208_s20, 64 }
 0x174   : > { %p2573_p8 = scmp.ne.s32.totalorder %s3208_s20, %s2572_s18  ;;  %p2578_p10 = scmp.lt.u32.totalorder %s3208_s20, %s3538_s22 }
 0x175   : > { %p2579_p12 = scmp.lt.u32.totalorder %s2577_s4, %s2572_s18  ;;  %p2581_p2 = scmp.lt.u32.totalorder %s2572_s18, %s3208_s20 }
 0x176   : > { %p2575_p13 = pnand %p2573_p8, %p3541_p6 }
 0x177   : > { %p2580_p3 = por %p2579_p12, %p2578_p10 }
 0x178   : > { %p2576_p9 = pneg %p2575_p13 }
 0x179   : > { %p2582_p4 = por %p2581_p2, %p2580_p3 }
 0x17b   : > { %p2583_p11 = pnand %p2582_p4, %p2576_p9 }
 0x17d   : > { %2586 = shalt.err (!%p2583_p11)
}
 0x17e   : > { %s2587_s3 = scalar_lea.vmem %s3211_s21, 64  ;;  %s2742_s25 = smov [#allocation3]  }
 0x17f   : > { %p2588_p1 = scmp.ne.s32.totalorder %s3211_s21, %s2587_s3  ;;  %s2592_s11 = sshll.u32 %s2742_s25, 4  ;;  %s2593_s11 = int_to_ptr.vmem [resolvable:$false] %s2592_s11 }
 0x180   : > { %s2594_s24 = scalar_lea.vmem %s2593_s11, 128  ;;  %p2595_p7 = scmp.lt.s32.totalorder %s3211_s21, %s2593_s11 }
 0x181   : > { %p2590_p0 = pnand %p2588_p1, %p3541_p6  ;;  %p2596_p8 = scmp.lt.s32.totalorder %s2594_s24, %s2587_s3 }
 0x183   : > { %p2591_p5 = pneg %p2590_p0  ;;  %p2597_p13 = por %p2596_p8, %p2595_p7 }
 0x185   : > { %p2598_p10 = pnand %p2597_p13, %p2591_p5 }
 0x187   : > { %2601 = shalt.err (!%p2598_p10)
}
 0x188   : > { %p3542_p9 = scmp.ne.s32.totalorder %s3528_s0, 0  ;;  %s563_s7 = scalar_lea.vmem [#allocation8], %s3038_s27 }
 0x189   : > { %s570_s18 = sshll.u32 %s563_s7, 4  ;;  %s2602_s28 = scalar_lea.hbm %s3217_s2, 64  ;;  %s571_s18 = int_to_ptr.vmem [resolvable:$true] %s570_s18 }
 0x18a   : > { %2098 = dma.hbm_to_vmem [thread:$0]  (!%p3542_p9), %s3208_s20, 64, %s3211_s21, %s524_s16  }
 0x18b   : > { %p2603_p12 = scmp.ne.s32.totalorder %s3217_s2, %s2602_s28  ;;  %s2607_s23 = scalar_lea.hbm %s3539_s1, 128 }
 0x18c   : > { %p2608_p4 = scmp.lt.u32.totalorder %s3217_s2, %s3539_s1  ;;  %p2609_p11 = scmp.lt.u32.totalorder %s2607_s23, %s2602_s28 }
 0x18d   : > { %p2605_p3 = pnand %p2603_p12, %p3541_p6  ;;  %p2611_p0 = scmp.lt.u32.totalorder %s2602_s28, %s3217_s2 }
 0x18e   : > { %p2610_p1 = por %p2609_p11, %p2608_p4 }
 0x18f   : > { %p2606_p2 = pneg %p2605_p3 }
 0x190   : > { %p2612_p5 = por %p2611_p0, %p2610_p1 }
 0x192   : > { %p2613_p7 = pnand %p2612_p5, %p2606_p2 }
 0x194   : > { %2616 = shalt.err (!%p2613_p7)
}
 0x195   : > { %s2617_s27 = scalar_lea.vmem %s571_s18, 64  ;;  %s2743_s20 = smov [#allocation8]  }
 0x196   : > { %p2618_p8 = scmp.ne.s32.totalorder %s571_s18, %s2617_s27  ;;  %s2622_s21 = sshll.u32 %s2743_s20, 4  ;;  %s2623_s21 = int_to_ptr.vmem [resolvable:$false] %s2622_s21 }
 0x197   : > { %s2624_s16 = scalar_lea.vmem %s2623_s21, 128  ;;  %p2625_p12 = scmp.lt.s32.totalorder %s571_s18, %s2623_s21 }
 0x198   : > { %p2620_p13 = pnand %p2618_p8, %p3541_p6  ;;  %p2626_p3 = scmp.lt.s32.totalorder %s2624_s16, %s2617_s27 }
 0x19a   : > { %p2621_p10 = pneg %p2620_p13  ;;  %p2627_p9 = por %p2626_p3, %p2625_p12 }
 0x19c   : > { %p2628_p4 = pnand %p2627_p9, %p2621_p10 }
 0x19e   : > { %2631 = shalt.err (!%p2628_p4)
}
 0x19f   : > { %p3543_p11 = scmp.ne.s32.totalorder %s3528_s0, 0  ;;  %s3544_s25 = sld [smem:[#allocation37_spill]] }
 0x1a1   : > { %2104 = dma.hbm_to_vmem [thread:$0]  (!%p3543_p11), %s3217_s2, 64, %s571_s18, %s3057_s5  }
 0x1a5   : > { %p3545_p2 = scmp.ne.s32.totalorder %s3544_s25, 0 }
 0x1a6   : > { %s3264_s9 = sand.u32 (!%p3545_p2), 1, %s2718_s30   ;;  %p3546_p6 = scmp.ne.s32.totalorder (!%p3545_p2), %s3524_s14, 0 }
 0x1a7   : > { %579 = sbr.rel (%p3545_p2) target bundleno = 3184 (0xc70), region = 76  ;;  %s3267_s11 = sshll.u32 (!%p3545_p2), %s3264_s9, 2 }
 0x1a8   : > { %s582_s24 = scalar_lea.sflag (!%p3545_p2), [#allocation4], %s3264_s9  ;;  %s585_s7 = scalar_lea.vmem (!%p3545_p2), [#allocation3], %s3267_s11 }
 0x1ae   : > { %2677 = dma.done.wait (%p3546_p6), %s582_s24, 64  }
 0x1af   : > { %2679 = vsyncadd (%p3546_p6), %s582_s24, 4294967232  ;;  %s590_s5 = sand.u32 1, %s2859_s19   ;;  %s594_s2 = scalar_lea.vmem [#allocation6], %s3267_s11 }
 0x1b0   : > { %s591_s0 = scalar_lea.sflag [#allocation7], %s590_s5 }
 0x1b1   : > { %2681 = dma.done.wait (%p3546_p6), %s591_s0, 128  }
 0x1b2   : > { %2683 = vsyncadd (%p3546_p6), %s591_s0, 4294967168  ;;  %s603_s18 = scalar_lea.vmem [#allocation8], %s3267_s11  ;;  %p3547_p9 = scmp.eq.s32.totalorder %s2859_s19, 0 }
 0x1b4   : > { %2685 = dma.done.wait (%p3547_p9), [#allocation10], 256   ;;  %p3548_p1 = pmov %p3547_p9 }
 0x1b6   : > { %2687 = vsyncadd (%p3548_p1), [#allocation10], 4294967040  ;;  %p3549_p0 = pmov %p3548_p1 }
 0x1b8   : > { %2689 = dma.done.wait (%p3549_p0), [#allocation13], 144   ;;  %p3550_p5 = pmov %p3549_p0 }
 0x1b9   : > { %p3551_p7 = pmov %p3549_p0 }
 0x1ba   : > { %2691 = vsyncadd (%p3550_p5), [#allocation13], 4294967152 }
 0x1bb   : > { %2693 = dma.done.wait (%p3551_p7), [#allocation16], 32   ;;  %p3552_p8 = pmov %p3549_p0 }
 0x1bc   : > { %p3553_p13 = pmov %p3549_p0 }
 0x1bd   : > { %2695 = vsyncadd (%p3552_p8), [#allocation16], 4294967264 }
 0x1be   : > { %2697 = dma.done.wait (%p3553_p13), [#allocation19], 512   ;;  %p3554_p10 = pmov %p3549_p0 }
 0x1bf   : > { %p3555_p12 = pmov %p3549_p0 }
 0x1c0   : > { %2699 = vsyncadd (%p3554_p10), [#allocation19], 4294966784 }
 0x1c1   : > { %2701 = dma.done.wait (%p3555_p12), [#allocation22], 512   ;;  %p3556_p3 = pmov %p3549_p0 }
 0x1c2   : > { %p3557_p4 = pmov %p3549_p0 }
 0x1c3   : > { %2703 = vsyncadd (%p3556_p3), [#allocation22], 4294966784 }
 0x1c4   : > { %2705 = dma.done.wait (%p3557_p4), [#allocation25], 512   ;;  %p3558_p11 = pmov %p3549_p0 }
 0x1c5   : > { %vm710_vm0 = vcmask 261120   ;;  %v703_v0 = vld [vmem:[%s585_s7] sm:$0xf]  ;;  %v704_v1 = vld [vmem:[%s594_s2] sm:$0xf]  ;;  %v2196_v8 = vld [vmem:[#allocation18] sm:$0xff]   ;;  %v720_v13 = vlaneseq }
 0x1c6   : > { %2707 = vsyncadd (%p3558_p11), [#allocation25], 4294966784  ;;  %v3306_v2 = vunpack.c.l.bf16 %v703_v0  ;;  %v727_v3 = vunpack.c.l.bf16 %v704_v1  ;;  %v2744_v9 = vmov 0.0   ;;  %v2197_v10 = vld [vmem:[#allocation18 + $0x8] sm:$0xff]   ;;  %vm2745_vm1 = vmmov 0   ;;  %v2198_v30 = vld [vmem:[#allocation20] sm:$0xff]  }
 0x1c7   : > { %1917 = vmatprep.subr.bf16.mxu1 %v2744_v9  ;;  %1933 = vmatprep.subr.bf16.mxu0 %v2744_v9  ;;  %v721_v17 = vshrl.u32 %v720_v13, 7  ;;  %v707_v19 = vld [vmem:[#allocation14] sm:$0x1]  ;;  %v726_v22 = vld [vmem:[#allocation15] sm:$0x1]  ;;  %v873_v36 = vld [vmem:[#allocation11] sm:$0xff] }
 0x1c8   : > { %v709_v4 = vmul.f32 %v3306_v2, %v3306_v2  ;;  %v728_v5 = vmul.f32 %v727_v3, %v727_v3  ;;  %1918 = vmatpush3.bf16.msra.mxu1 %v2196_v8  ;;  %1921 = vmatprep.mubr.msk.bf16.mxu1 %vm2745_vm1, %v2744_v9  ;;  %v719_v20 = vunpack.c.l.bf16 %v707_v19  ;;  %v736_v24 = vunpack.c.l.bf16 %v726_v22  ;;  %v2199_v34 = vld [vmem:[#allocation20 + $0x8] sm:$0xff]   ;;  %s2746_s14 = smov 4   ;;  %s2747_s28 = smov 112   ;;  %v864_v56 = vld [vmem:[#allocation9] sm:$0xff] }
 0x1c9   : > { %1919 = vmatprep.subr.bf16.mxu1 %v2744_v9  ;;  %1935 = vmatprep.mubr.msk.bf16.mxu0 %vm2745_vm1, %v2744_v9  ;;  %v3320_v21 = vsub.s32 0, %v721_v17  ;;  %s2748_s13 = smov 104   ;;  %s2749_s4 = smov 32   ;;  %vm866_vm2 = vcmask 1047808   ;;  %v884_v49 = vld [vmem:[#allocation12] sm:$0xff]  ;;  %vm896_vm3 = vcmask 64512  }
 0x1ca   : > { %v711_v6 = vsel %vm710_vm0, %v709_v4, 0.0  ;;  %v729_v7 = vsel %vm710_vm0, %v728_v5, 0.0  ;;  %s2750_s23 = smov 28   ;;  %s2751_s6 = smov 124   ;;  %vm961_vm4 = vcmask 1043456   ;;  %vm1122_vm5 = vcmask 130112  }
 0x1cb   : > { %712 = vadd.xlane.f32.xlu0 %v711_v6  ;;  %v723_v23 = vrot.slane %v719_v20, %v3320_v21  ;;  %v740_v28 = vrot.slane %v736_v24, %v3320_v21  ;;  %s2752_s3 = smov 100   ;;  %s2753_s27 = smov 120   ;;  %vm1238_vm6 = vcmask 195712   ;;  %vm1354_vm7 = vcmask 261312  }
 0x1cc   : > { %1920 = vmatpush3.bf16.msra.mxu1 %v2197_v10  ;;  %s2754_s20 = smov 88   ;;  %s2755_s21 = smov 96   ;;  %vm1538_vm8 = vcmask 523264   ;;  %vm1584_vm9 = vcmask 257024  }
 0x1cd   : > { %1925 = vmatprep.subr.bf16.mxu1 %v2744_v9  ;;  %s2756_s16 = smov 72   ;;  %s2757_s25 = smov 80  }
 0x1ce   : > { %s2758_s24 = smov 8   ;;  %s2759_s7 = smov 16  }
 0x1cf   : > { %730 = vadd.xlane.f32.xlu0 %v729_v7  ;;  %s2760_s5 = smov 24   ;;  %s2761_s0 = smov 64  }
 0x1d0   : > { %s1881_s2 = sshll.u32 %s2859_s19, 6  ;;  %s1587_s19 = scalar_lea.sflag [#allocation5], %s3264_s9 }
 0x1d1   : > { %p3560_p6 = scmp.ne.s32.totalorder %s3525_s26, 0 }
 0x1e5   : > { %875 = vrot.lane.b32.xlu0 %v873_v36, %s2746_s14 }
 0x258   : > { %v713_v11 = vpop.xlane.xlu0 %712 }
 0x259   : > { %v715_v12 = vmul.f32 0.03125, %v713_v11  ;;  %v705_v11 = vld [vmem:[%s603_s18] sm:$0xf]  ;;  %s701_s18 = scalar_lea.vmem [#allocation26], %s3267_s11 }
 0x25a   : > { %s1600_s14 = sshll.u32 %s701_s18, 4  ;;  %s3416_s14 = int_to_ptr.vmem [resolvable:$true] %s1600_s14 }
 0x25b   : > { %v716_v14 = vadd.f32 1e-06, %v715_v12  ;;  %v706_v12 = vunpack.c.l.bf16 %v705_v11  ;;  %s2632_s11 = scalar_lea.vmem %s3416_s14, 64 }
 0x25c   : > { %v731_v15 = vpop.xlane.xlu0 %730  ;;  %p2633_p2 = scmp.ne.s32.totalorder %s3416_s14, %s2632_s11 }
 0x25d   : > { %2208 = vrsqrt.f32 %v716_v14  ;;  %v732_v16 = vmul.f32 0.03125, %v731_v15 }
 0x25e   : > { %p2634_p9 = pnand %p2633_p2, %p3560_p6 }
 0x25f   : > { %v733_v18 = vadd.f32 1e-06, %v732_v16 }
 0x260   : > { %v876_v51 = vpop.permute.xlu0 %875  ;;  %p2635_p1 = pneg %p2634_p9 }
 0x261   : > { %2210 = vrsqrt.f32 %v733_v18 }
 0x267   : > { %v2209_v25 = vpop.eup %2208 }
 0x268   : > { %v718_v26 = vmul.f32 %v2209_v25, %v3306_v2 }
 0x26a   : > { %v724_v27 = vmul.f32 %v723_v23, %v718_v26 }
 0x26b   : > { %v2211_v29 = vpop.eup %2210 }
 0x26c   : > { %v735_v31 = vmul.f32 %v2211_v29, %v727_v3  ;;  %v725_v32 = vpack.c.bf16 %v724_v27, %v724_v27 }
 0x26e   : > { %1922 = vmatmul.mubr.msk.bf16.vlgmr.msra.gmra.mrb[0].mxu1 %vm710_vm0, %v725_v32  ;;  %v741_v33 = vmul.f32 %v740_v28, %v735_v31 }
 0x26f   : > { %1926 = vmatpush3.bf16.msra.mxu1 %v2198_v30  ;;  %1929 = vmatprep.mubr.msk.bf16.mxu1 %vm2745_vm1, %v2744_v9 }
 0x270   : > { %1927 = vmatprep.subr.bf16.mxu1 %v2744_v9  ;;  %v742_v35 = vpack.c.bf16 %v741_v33, %v741_v33 }
 0x273   : > { %1928 = vmatpush3.bf16.msra.mxu1 %v2199_v34 }
 0x274   : > { %1939 = vmatprep.subr.bf16.mxu1 %v2744_v9 }
 0x276   : > { %1930 = vmatmul.mubr.msk.bf16.vlgmr.msra.gmra.mrb[4].mxu1 %vm710_vm0, %v742_v35 }
 0x277   : > { %1941 = vmatprep.mubr.msk.bf16.mxu1 %vm2745_vm1, %v2744_v9 }
 0x341   : > { %v796_v37 = vpop.f32.mrb[0].mxu1 }
 0x342   : > { %v802_v38 = vmul.f32 0.35355338, %v796_v37  ;;  %v1923_v39 = vpop.f32.mrb[1].mxu1 }
 0x343   : > { %v799_v40 = vpop.f32.mrb[2].mxu1 }
 0x344   : > { %v803_v41 = vpack.c.bf16 %v802_v38, %v802_v38  ;;  %v1924_v42 = vpop.f32.mrb[3].mxu1 }
 0x346   : > { %1124 = vrot.lane.b32.xlu0 %v803_v41, %s2747_s28 }
 0x349   : > { %v3334_v43 = vpop.f32.mrb[4].mxu1 }
 0x34a   : > { %1240 = vrot.lane.b32.xlu0 %v803_v41, %s2748_s13  ;;  %867 = vrot.lane.b32.xlu1 %v3334_v43, %s2749_s4  ;;  %v1931_v44 = vpop.f32.mrb[5].mxu1  ;;  %v865_v58 = vmul.f32 %v864_v56, %v3334_v43 }
 0x34b   : > { %v860_v45 = vpop.f32.mrb[6].mxu1 }
 0x34c   : > { %v1932_v46 = vpop.f32.mrb[7].mxu1 }
 0x3b8   : > { %v1125_v7 = vpop.permute.xlu0 %1124 }
 0x3bc   : > { %v868_v47 = vpop.permute.xlu1 %867  ;;  %v1241_v10 = vpop.permute.xlu0 %1240 }
 0x3bd   : > { %v869_v48 = vsel %vm866_vm2, %v868_v47, %v3334_v43 }
 0x3be   : > { %870 = vrot.lane.b32.xlu1 %v869_v48, %s2749_s4  ;;  %s3559_s4 = sld [smem:[#allocation52_spill]] }
 0x3c2   : > { %886 = vrot.lane.b32.xlu1 %v884_v49, %s2750_s23 }
 0x3c4   : > { %s3414_s23 = scalar_lea.hbm %s3559_s4, %s1881_s2 }
 0x430   : > { %v871_v50 = vpop.permute.xlu1 %870 }
 0x431   : > { %v872_v52 = vsel %vm866_vm2, %v871_v50, %v3334_v43 }
 0x432   : > { %v878_v53 = vmul.f32 %v876_v51, %v872_v52 }
 0x434   : > { %v887_v54 = vpop.permute.xlu1 %886  ;;  %880 = vrot.lane.b32.xlu1 %v878_v53, %s2751_s6  ;;  %s2762_s6 = smov [#allocation26]  }
 0x435   : > { %v889_v55 = vmul.f32 %v887_v54, %v872_v52  ;;  %v863_v54 = vpack.c.bf16 %v3334_v43, %v3334_v43 }
 0x438   : > { %891 = vrot.lane.b32.xlu1 %v889_v55, %s2752_s3  ;;  %s2636_s3 = sshll.u32 %s2762_s6, 4  ;;  %s2637_s3 = int_to_ptr.vmem [resolvable:$false] %s2636_s3 }
 0x439   : > { %p2639_p0 = scmp.lt.s32.totalorder %s3416_s14, %s2637_s3 }
 0x4a6   : > { %v881_v57 = vpop.permute.xlu1 %880 }
 0x4a7   : > { %v883_v59 = vadd.f32 %v881_v57, %v865_v58 }
 0x4aa   : > { %v892_v60 = vpop.permute.xlu1 %891 }
 0x4ab   : > { %v894_v61 = vadd.f32 %v892_v60, %v883_v59 }
 0x4ad   : > { %v895_v62 = vpack.c.bf16 %v894_v61, %v894_v61 }
 0x4af   : > { %1010 = vrot.lane.b32.xlu1 %v895_v62, %s2753_s27  ;;  %v901_v63 = vsel %vm896_vm3, %v895_v62, 0 }
 0x4b0   : > { %1934 = vmatpush3.bf16.xpose.msra.mxu0 %v901_v63 }
 0x4b1   : > { %1945 = vmatprep.subr.bf16.mxu0 %v2744_v9 }
 0x4b3   : > { %1007 = vrot.lane.b32.xlu1 %v803_v41, %s2753_s27  ;;  %s2638_s27 = scalar_lea.vmem %s2637_s3, 128 }
 0x4b4   : > { %p2640_p5 = scmp.lt.s32.totalorder %s2638_s27, %s2632_s11 }
 0x4b6   : > { %p2641_p7 = por %p2640_p5, %p2639_p0 }
 0x4b7   : > { %1126 = vrot.lane.b32.xlu1 %v895_v62, %s2747_s28  ;;  %1936 = vmatmul.mubr.msk.bf16.vlgmr.msra.gmra.mrb[0].mxu0 %vm896_vm3, %v803_v41 }
 0x4b8   : > { %1947 = vmatprep.mubr.msk.bf16.mxu0 %vm2745_vm1, %v2744_v9  ;;  %p2642_p8 = pnand %p2641_p7, %p2635_p1 }
 0x4bb   : > { %1242 = vrot.lane.b32.xlu1 %v895_v62, %s2748_s13 }
 0x521   : > { %v1011_v0 = vpop.permute.xlu1 %1010 }
 0x522   : > { %v1016_v1 = vsel %vm896_vm3, %v1011_v0, 0 }
 0x523   : > { %1946 = vmatpush3.bf16.xpose.msra.mxu0 %v1016_v1 }
 0x524   : > { %1957 = vmatprep.subr.bf16.mxu0 %v2744_v9 }
 0x525   : > { %v1008_v3 = vpop.permute.xlu1 %1007 }
 0x529   : > { %v1127_v4 = vpop.permute.xlu1 %1126 }
 0x52a   : > { %v1132_v5 = vsel %vm896_vm3, %v1127_v4, 0  ;;  %1948 = vmatmul.mubr.msk.bf16.vlgmr.msra.gmra.mrb[4].mxu0 %vm896_vm3, %v1008_v3 }
 0x52b   : > { %1958 = vmatpush3.bf16.xpose.msra.mxu0 %v1132_v5  ;;  %1959 = vmatprep.mubr.msk.bf16.mxu0 %vm2745_vm1, %v2744_v9 }
 0x52c   : > { %1969 = vmatprep.subr.bf16.mxu0 %v2744_v9 }
 0x52d   : > { %v1243_v6 = vpop.permute.xlu1 %1242 }
 0x52e   : > { %v1248_v8 = vsel %vm896_vm3, %v1243_v6, 0 }
 0x532   : > { %1960 = vmatmul.mubr.msk.bf16.vlgmr.msra.gmra.mrb[8].mxu0 %vm896_vm3, %v1125_v7 }
 0x533   : > { %1970 = vmatpush3.bf16.xpose.msra.mxu0 %v1248_v8  ;;  %1971 = vmatprep.mubr.msk.bf16.mxu0 %vm2745_vm1, %v2744_v9 }
 0x534   : > { %1981 = vmatprep.subr.bf16.mxu0 %v2744_v9 }
 0x53a   : > { %1972 = vmatmul.mubr.msk.bf16.vlgmr.msra.gmra.mrb[12].mxu0 %vm896_vm3, %v1241_v10 }
 0x53b   : > { %1985 = vmatprep.mubr.msk.bf16.mxu0 %vm2745_vm1, %v2744_v9 }
 0x58a   : > { %v937_v13 = vpop.f32.mrb[0].mxu0 }
 0x58b   : > { %v938_v14 = vadd.f32 %v937_v13, %v706_v12  ;;  %v1937_v15 = vpop.f32.mrb[1].mxu0 }
 0x58c   : > { %v940_v16 = vpop.f32.mrb[2].mxu0 }
 0x58d   : > { %v1938_v17 = vpop.f32.mrb[3].mxu0  ;;  %v943_v18 = vsel %vm896_vm3, %v938_v14, -inf }
 0x58e   : > { %944 = vmax.xlane.f32.xlu1 %v943_v18 }
 0x5fd   : > { %v1052_v19 = vpop.f32.mrb[4].mxu0 }
 0x5fe   : > { %v1053_v20 = vadd.f32 %v1052_v19, %v706_v12  ;;  %v1949_v22 = vpop.f32.mrb[5].mxu0 }
 0x5ff   : > { %v1055_v23 = vpop.f32.mrb[6].mxu0 }
 0x600   : > { %v1950_v24 = vpop.f32.mrb[7].mxu0  ;;  %v1058_v25 = vsel %vm896_vm3, %v1053_v20, -inf }
 0x601   : > { %1059 = vmax.xlane.f32.xlu0 %v1058_v25 }
 0x605   : > { %v1168_v26 = vpop.f32.mrb[8].mxu0 }
 0x606   : > { %v1169_v27 = vadd.f32 %v1168_v26, %v706_v12  ;;  %v1961_v28 = vpop.f32.mrb[9].mxu0 }
 0x607   : > { %v1171_v29 = vpop.f32.mrb[10].mxu0 }
 0x608   : > { %v1962_v30 = vpop.f32.mrb[11].mxu0  ;;  %v1174_v31 = vsel %vm896_vm3, %v1169_v27, -inf }
 0x609   : > { %1175 = vmax.xlane.f32.xlu0 %v1174_v31  ;;  %v2200_v30 = vld [vmem:[#allocation21] sm:$0xff]   ;;  %v2201_v31 = vld [vmem:[#allocation21 + $0x8] sm:$0xff]  }
 0x60a   : > { %1982 = vmatpush3.bf16.msra.mxu0 %v2200_v30 }
 0x60b   : > { %1983 = vmatprep.subr.bf16.mxu0 %v2744_v9 }
 0x60d   : > { %v1284_v32 = vpop.f32.mrb[12].mxu0 }
 0x60e   : > { %v1285_v33 = vadd.f32 %v1284_v32, %v706_v12  ;;  %v1973_v34 = vpop.f32.mrb[13].mxu0  ;;  %1984 = vmatpush3.bf16.msra.mxu0 %v2201_v31 }
 0x60f   : > { %v1287_v35 = vpop.f32.mrb[14].mxu0  ;;  %1997 = vmatprep.subr.bf16.mxu0 %v2744_v9 }
 0x610   : > { %v1974_v36 = vpop.f32.mrb[15].mxu0  ;;  %v1290_v37 = vsel %vm896_vm3, %v1285_v33, -inf }
 0x611   : > { %1291 = vmax.xlane.f32.xlu1 %v1290_v37 }
 0x61b   : > { %v945_v38 = vpop.xlane.xlu1 %944 }
 0x61c   : > { %v946_v39 = vsub.f32 %v938_v14, %v945_v38 }
 0x61e   : > { %v947_v40 = vmul.f32 1.442695, %v946_v39 }
 0x620   : > { %2212 = vpow2.f32 %v947_v40 }
 0x62a   : > { %v2213_v41 = vpop.eup %2212 }
 0x62b   : > { %v949_v42 = vsel %vm896_vm3, %v2213_v41, 0.0 }
 0x62c   : > { %950 = vadd.xlane.f32.xlu0 %v949_v42 }
 0x68e   : > { %v1060_v44 = vpop.xlane.xlu0 %1059 }
 0x68f   : > { %v1061_v45 = vsub.f32 %v1053_v20, %v1060_v44 }
 0x691   : > { %v1062_v46 = vmul.f32 1.442695, %v1061_v45 }
 0x693   : > { %2214 = vpow2.f32 %v1062_v46 }
 0x696   : > { %v1176_v47 = vpop.xlane.xlu0 %1175 }
 0x697   : > { %v1177_v48 = vsub.f32 %v1169_v27, %v1176_v47 }
 0x699   : > { %v1178_v49 = vmul.f32 1.442695, %v1177_v48 }
 0x69b   : > { %2216 = vpow2.f32 %v1178_v49 }
 0x69d   : > { %v2215_v50 = vpop.eup %2214 }
 0x69e   : > { %v1064_v51 = vsel %vm896_vm3, %v2215_v50, 0.0  ;;  %v1292_v55 = vpop.xlane.xlu1 %1291 }
 0x69f   : > { %1065 = vadd.xlane.f32.xlu1 %v1064_v51  ;;  %v1293_v56 = vsub.f32 %v1285_v33, %v1292_v55 }
 0x6a1   : > { %v1294_v57 = vmul.f32 1.442695, %v1293_v56 }
 0x6a3   : > { %2218 = vpow2.f32 %v1294_v57 }
 0x6a5   : > { %v2217_v52 = vpop.eup %2216 }
 0x6a6   : > { %v1180_v53 = vsel %vm896_vm3, %v2217_v52, 0.0 }
 0x6a7   : > { %1181 = vadd.xlane.f32.xlu0 %v1180_v53  ;;  %v2202_v53 = vld [vmem:[#allocation23] sm:$0xff]  }
 0x6ad   : > { %v2219_v58 = vpop.eup %2218 }
 0x6ae   : > { %v1296_v59 = vsel %vm896_vm3, %v2219_v58, 0.0 }
 0x6b0   : > { %1070 = vrot.lane.b32.xlu1 %v863_v54, %s2754_s20 }
 0x6b9   : > { %v951_v60 = vpop.xlane.xlu0 %950 }
 0x6ba   : > { %2220 = vrcp.f32 %v951_v60 }
 0x6bd   : > { %956 = vrot.lane.b32.xlu0 %v863_v54, %s2755_s21 }
 0x6c1   : > { %1302 = vrot.lane.b32.xlu0 %v863_v54, %s2756_s16 }
 0x6c4   : > { %v2221_v43 = vpop.eup %2220 }
 0x6c5   : > { %v953_v63 = vmul.f32 %v2221_v43, %v2213_v41 }
 0x6c7   : > { %v954_v4 = vpack.c.bf16 %v953_v63, %v953_v63  ;;  %v2204_v63 = vld [vmem:[#allocation24] sm:$0xff]  }
 0x6d4   : > { %1297 = vadd.xlane.f32.xlu1 %v1296_v59 }
 0x6e5   : > { %1186 = vrot.lane.b32.xlu1 %v863_v54, %s2757_s25  ;;  %v2203_v54 = vld [vmem:[#allocation23 + $0x8] sm:$0xff]  }
 0x72c   : > { %v1066_v61 = vpop.xlane.xlu1 %1065 }
 0x72d   : > { %2222 = vrcp.f32 %v1066_v61 }
 0x730   : > { %v1071_v3 = vpop.permute.xlu1 %1070 }
 0x731   : > { %v1076_v6 = vsel %vm961_vm4, %v1071_v3, 0  ;;  %v2207_v3 = vld [vmem:[#allocation24 + $0x18] sm:$0xff]  }
 0x734   : > { %v1182_v62 = vpop.xlane.xlu0 %1181 }
 0x735   : > { %2224 = vrcp.f32 %v1182_v62 }
 0x737   : > { %v2223_v5 = vpop.eup %2222 }
 0x738   : > { %v957_v0 = vpop.permute.xlu0 %956  ;;  %v1068_v7 = vmul.f32 %v2223_v5, %v2215_v50 }
 0x739   : > { %v963_v1 = vsel %vm961_vm4, %v957_v0, 0  ;;  %v2205_v0 = vld [vmem:[#allocation24 + $0x8] sm:$0xff]  }
 0x73a   : > { %1940 = vmatpush3.bf16.msra.mxu1 %v963_v1  ;;  %v1069_v8 = vpack.c.bf16 %v1068_v7, %v1068_v7  ;;  %v2206_v1 = vld [vmem:[#allocation24 + $0x10] sm:$0xff]  }
 0x73b   : > { %1951 = vmatprep.subr.bf16.mxu1 %v2744_v9 }
 0x73c   : > { %v1303_v15 = vpop.permute.xlu0 %1302 }
 0x73d   : > { %1942 = vmatmul.mubr.msk.bf16.vlgmr.msra.gmra.mrb[8].mxu1 %vm896_vm3, %v954_v4  ;;  %v1308_v17 = vsel %vm961_vm4, %v1303_v15, 0 }
 0x73e   : > { %1952 = vmatpush3.bf16.msra.mxu1 %v1076_v6  ;;  %1953 = vmatprep.mubr.msk.bf16.mxu1 %vm2745_vm1, %v2744_v9 }
 0x73f   : > { %1963 = vmatprep.subr.bf16.mxu1 %v2744_v9  ;;  %v2225_v10 = vpop.eup %2224 }
 0x740   : > { %v1184_v12 = vmul.f32 %v2225_v10, %v2217_v52 }
 0x742   : > { %v1185_v16 = vpack.c.bf16 %v1184_v12, %v1184_v12 }
 0x745   : > { %1954 = vmatmul.mubr.msk.bf16.vlgmr.msra.gmra.mrb[12].mxu1 %vm896_vm3, %v1069_v8 }
 0x746   : > { %1965 = vmatprep.mubr.msk.bf16.mxu1 %vm2745_vm1, %v2744_v9 }
 0x761   : > { %v1298_v11 = vpop.xlane.xlu1 %1297 }
 0x762   : > { %2226 = vrcp.f32 %v1298_v11 }
 0x765   : > { %v1187_v13 = vpop.permute.xlu1 %1186 }
 0x766   : > { %v1192_v14 = vsel %vm961_vm4, %v1187_v13, 0 }
 0x767   : > { %1964 = vmatpush3.bf16.msra.mxu1 %v1192_v14 }
 0x768   : > { %1975 = vmatprep.subr.bf16.mxu1 %v2744_v9 }
 0x76a   : > { %1966 = vmatmul.mubr.msk.bf16.vlgmr.msra.gmra.mrb[16].mxu1 %vm896_vm3, %v1185_v16 }
 0x76b   : > { %1976 = vmatpush3.bf16.msra.mxu1 %v1308_v17  ;;  %1977 = vmatprep.mubr.msk.bf16.mxu1 %vm2745_vm1, %v2744_v9 }
 0x76c   : > { %v2227_v18 = vpop.eup %2226  ;;  %1989 = vmatprep.subr.bf16.mxu1 %v2744_v9 }
 0x76d   : > { %v1300_v19 = vmul.f32 %v2227_v18, %v2219_v58  ;;  %v1418_v58 = vld [vmem:[#allocation17] sm:$0x1] }
 0x76e   : > { %v1427_v59 = vunpack.c.l.bf16 %v1418_v58 }
 0x76f   : > { %v1301_v20 = vpack.c.bf16 %v1300_v19, %v1300_v19 }
 0x772   : > { %1978 = vmatmul.mubr.msk.bf16.vlgmr.msra.gmra.mrb[20].mxu1 %vm896_vm3, %v1301_v20 }
 0x773   : > { %1993 = vmatprep.mubr.msk.bf16.mxu1 %vm2745_vm1, %v2744_v9  ;;  %1990 = vmatpush3.bf16.msra.mxu1 %v2202_v53 }
 0x774   : > { %1991 = vmatprep.subr.bf16.mxu1 %v2744_v9 }
 0x777   : > { %1992 = vmatpush3.bf16.msra.mxu1 %v2203_v54 }
 0x810   : > { %v999_v22 = vpop.f32.mrb[8].mxu1 }
 0x811   : > { %1005 = vst.msk [vmem:[#allocation2] sm:$0xff] %vm896_vm3, %v999_v22  ;;  %v1943_v23 = vpop.f32.mrb[9].mxu1 }
 0x812   : > { %v1002_v24 = vpop.f32.mrb[10].mxu1 }
 0x813   : > { %v1944_v25 = vpop.f32.mrb[11].mxu1 }
 0x818   : > { %v1112_v26 = vpop.f32.mrb[12].mxu1 }
 0x819   : > { %1119 = vrot.lane.b32.xlu1 %v1112_v26, %s2758_s24  ;;  %v1955_v27 = vpop.f32.mrb[13].mxu1 }
 0x81a   : > { %v1115_v28 = vpop.f32.mrb[14].mxu1 }
 0x81b   : > { %v1956_v29 = vpop.f32.mrb[15].mxu1 }
 0x83d   : > { %v1228_v32 = vpop.f32.mrb[16].mxu1 }
 0x83e   : > { %1235 = vrot.lane.b32.xlu0 %v1228_v32, %s2759_s7  ;;  %v1967_v33 = vpop.f32.mrb[17].mxu1 }
 0x83f   : > { %v1231_v34 = vpop.f32.mrb[18].mxu1 }
 0x840   : > { %v1968_v35 = vpop.f32.mrb[19].mxu1 }
 0x845   : > { %v1344_v36 = vpop.f32.mrb[20].mxu1 }
 0x846   : > { %1351 = vrot.lane.b32.xlu1 %v1344_v36, %s2760_s5  ;;  %v1979_v37 = vpop.f32.mrb[21].mxu1 }
 0x847   : > { %v1347_v38 = vpop.f32.mrb[22].mxu1 }
 0x848   : > { %v1980_v39 = vpop.f32.mrb[23].mxu1 }
 0x88b   : > { %v1120_v40 = vpop.permute.xlu1 %1119 }
 0x88c   : > { %1123 = vst.msk [vmem:[#allocation2] sm:$0xff] %vm1122_vm5, %v1120_v40 }
 0x8b0   : > { %v1236_v41 = vpop.permute.xlu0 %1235 }
 0x8b1   : > { %1239 = vst.msk [vmem:[#allocation2] sm:$0xff] %vm1238_vm6, %v1236_v41 }
 0x8b8   : > { %v1352_v42 = vpop.permute.xlu1 %1351 }
 0x8b9   : > { %1355 = vst.msk [vmem:[#allocation2] sm:$0xff] %vm1354_vm7, %v1352_v42 }
 0x8c0   : > { %v1356_v44 = vld [vmem:[#allocation2] sm:$0xff] }
 0x8c1   : > { %v1357_v45 = vpack.c.bf16 %v1356_v44, %v1356_v44 }
 0x8c3   : > { %1986 = vmatmul.mubr.msk.bf16.vlgmr.msra.gmra.mrb[16].mxu0 %vm710_vm0, %v1357_v45 }
 0x8c4   : > { %2005 = vmatprep.mubr.msk.bf16.mxu0 %vm2745_vm1, %v2744_v9  ;;  %1998 = vmatpush3.bf16.msra.mxu0 %v2204_v63 }
 0x8c5   : > { %1999 = vmatprep.subr.bf16.mxu0 %v2744_v9 }
 0x8c8   : > { %2000 = vmatpush3.bf16.msra.mxu0 %v2205_v0 }
 0x8c9   : > { %2001 = vmatprep.subr.bf16.mxu0 %v2744_v9 }
 0x8cc   : > { %2002 = vmatpush3.bf16.msra.mxu0 %v2206_v1 }
 0x8cd   : > { %2003 = vmatprep.subr.bf16.mxu0 %v2744_v9 }
 0x8d0   : > { %2004 = vmatpush3.bf16.msra.mxu0 %v2207_v3 }
 0x996   : > { %v1411_v46 = vpop.f32.mrb[16].mxu0 }
 0x997   : > { %v1417_v47 = vadd.f32 %v1411_v46, %v3306_v2  ;;  %v1987_v48 = vpop.f32.mrb[17].mxu0  ;;  %v1431_v2 = vrot.slane %v1427_v59, %v3320_v21 }
 0x998   : > { %v1414_v49 = vpop.f32.mrb[18].mxu0 }
 0x999   : > { %v1988_v50 = vpop.f32.mrb[19].mxu0  ;;  %v1419_v51 = vmul.f32 %v1417_v47, %v1417_v47 }
 0x99b   : > { %v1420_v52 = vsel %vm710_vm0, %v1419_v51, 0.0 }
 0x99c   : > { %1421 = vadd.xlane.f32.xlu0 %v1420_v52 }
 0xa29   : > { %v1422_v55 = vpop.xlane.xlu0 %1421 }
 0xa2a   : > { %v1423_v56 = vmul.f32 0.03125, %v1422_v55 }
 0xa2c   : > { %v1424_v57 = vadd.f32 1e-06, %v1423_v56 }
 0xa2e   : > { %2228 = vrsqrt.f32 %v1424_v57 }
 0xa38   : > { %v2229_v60 = vpop.eup %2228 }
 0xa39   : > { %v1426_v61 = vmul.f32 %v2229_v60, %v1417_v47 }
 0xa3b   : > { %v1432_v43 = vmul.f32 %v1431_v2, %v1426_v61 }
 0xa3d   : > { %v1433_v62 = vpack.c.bf16 %v1432_v43, %v1432_v43 }
 0xa3f   : > { %1994 = vmatmul.mubr.msk.bf16.vlgmr.msra.gmra.mrb[24].mxu1 %vm710_vm0, %v1433_v62 }
 0xb12   : > { %v1487_v21 = vpop.f32.mrb[24].mxu1 }
 0xb13   : > { %1501 = vrot.lane.b32.xlu1 %v1487_v21, %s2761_s0  ;;  %v1995_v4 = vpop.f32.mrb[25].mxu1  ;;  %v1874_v7 = vmul.f32 -1.442695, %v1487_v21 }
 0xb14   : > { %v1490_v5 = vpop.f32.mrb[26].mxu1 }
 0xb15   : > { %v1996_v6 = vpop.f32.mrb[27].mxu1  ;;  %2230 = vpow2.f32 %v1874_v7 }
 0xb1f   : > { %v2231_v8 = vpop.eup %2230 }
 0xb20   : > { %v1496_v10 = vadd.f32 1.0, %v2231_v8 }
 0xb22   : > { %2232 = vrcp.f32 %v1496_v10 }
 0xb2c   : > { %v2233_v11 = vpop.eup %2232 }
 0xb2d   : > { %v1499_v12 = vmul.f32 %v2233_v11, %v1487_v21 }
 0xb85   : > { %v1502_v13 = vpop.permute.xlu1 %1501 }
 0xb86   : > { %v1504_v14 = vmul.f32 %v1502_v13, %v1499_v12 }
 0xb88   : > { %v1505_v9 = vpack.c.bf16 %v1504_v14, %v1504_v14 }
 0xb8a   : > { %2006 = vmatmul.mubr.msk.bf16.vlgmr.msra.gmra.mrb[20].mxu0 %vm1538_vm8, %v1505_v9 }
 0xc5d   : > { %v1576_v15 = vpop.f32.mrb[20].mxu0 }
 0xc5e   : > { %v1582_v16 = vadd.f32 %v1576_v15, %v1417_v47  ;;  %v2007_v17 = vpop.f32.mrb[21].mxu0 }
 0xc5f   : > { %v1579_v18 = vpop.f32.mrb[22].mxu0 }
 0xc60   : > { %v1583_v19 = vpack.c.bf16 %v1582_v16, %v1582_v16  ;;  %v2008_v20 = vpop.f32.mrb[23].mxu0 }
 0xc62   : > { %1585 = vst.msk [vmem:[%s701_s18] sm:$0xf] %vm1584_vm9, %v1583_v19 }
 0xc63   : > { %2645 = shalt.err (!%p2642_p8)
}
 0xc64   : > { %s2646_s9 = scalar_lea.hbm %s3414_s23, 64  ;;  %s2650_s16 = scalar_lea.hbm %s3559_s4, 128 }
 0xc65   : > { %p2647_p13 = scmp.ne.s32.totalorder %s3414_s23, %s2646_s9  ;;  %p2651_p3 = scmp.lt.u32.totalorder %s3414_s23, %s3559_s4 }
 0xc66   : > { %p2652_p4 = scmp.lt.u32.totalorder %s2650_s16, %s2646_s9  ;;  %p2654_p2 = scmp.lt.u32.totalorder %s2646_s9, %s3414_s23 }
 0xc67   : > { %p2648_p10 = pnand %p2647_p13, %p3560_p6 }
 0xc68   : > { %p2653_p11 = por %p2652_p4, %p2651_p3 }
 0xc69   : > { %p2649_p12 = pneg %p2648_p10 }
 0xc6a   : > { %p2655_p9 = por %p2654_p2, %p2653_p11 }
 0xc6c   : > { %p2656_p1 = pnand %p2655_p9, %p2649_p12 }
 0xc6e   : > { %2659 = shalt.err (!%p2656_p1)
}
 0xc6f   : > { %2059 = dma.vmem_to_hbm [thread:$0]  (%p3560_p6), %s3416_s14, 64, %s3414_s23, %s1587_s19  }
 0xc70 PF: > { %s3561_s7 = sld [smem:[#allocation40_spill]]  ;;  %s3562_s5 = sld [smem:[#allocation36_spill]] }
 0xc71   : > { %s1612_s0 = sand.u32 1, %s2714_s29  }
 0xc72   : > { %s1613_s2 = scalar_lea.sflag [#allocation5], %s1612_s0 }
 0xc76   : > { %p3563_p0 = scmp.ne.s32.totalorder %s3561_s7, 0  ;;  %p3564_p5 = scmp.ge.s32.totalorder %s3562_s5, 2 }
 0xc78   : > { %p2106_p7 = pnand %p3564_p5, %p3563_p0 }
 0xc7a   : > { %2709 = dma.done.wait (!%p2106_p7), %s1613_s2, 64  }
 0xc7b   : > { %2711 = vsyncadd (!%p2106_p7), %s1613_s2, 4294967232  ;;  %s3565_s16 = sld [smem:[#allocation38_spill]]  ;;  %s3566_s18 = sld [smem:[#allocation39_spill]] }
 0xc7c   : > { %s3567_s29 = smov %s2718_s30  ;;  %s3568_s30 = smov %s2722_s15 }
 0xc81   : > { %p36_p8 = scmp.ge.s32.totalorder %s3565_s16, 4   ;;  %s3569_s15 = smov %s3566_s18 }
 0xc83   :  { %38 = sbr.rel (!%p36_p8) target bundleno = 26 (0x1a), region = 189 }
 0xc8a   :  { %1618 = vsyncpa [#allocation4], 1 }
 0xc8b   :  { %1620 = vsyncpa [#allocation4 + $0x1], 1 }
 0xc8c   :  { %1621 = vsyncpa [#allocation7], 1 }
 0xc8d   :  { %1623 = vsyncpa [#allocation7 + $0x1], 1 }
 0xc8e   :  { %1624 = vsyncpa [#allocation10], 1 }
 0xc8f   :  { %1625 = vsyncpa [#allocation13], 1 }
 0xc90   :  { %1626 = vsyncpa [#allocation16], 1 }
 0xc91   :  { %1627 = vsyncpa [#allocation19], 1 }
 0xc92   :  { %1628 = vsyncpa [#allocation22], 1 }
 0xc93   :  { %1629 = vsyncpa [#allocation25], 1 }
 0xc94   :  { %1630 = vsyncpa [#allocation5], 1 }
 0xc95   :  { %1632 = vsyncpa [#allocation5 + $0x1], 1 }

</bundles_post_ra>
